<compile_context>
chip_gen: v7x
topology: tpu7x:2x2x1
jax: 0.10.0
libtpu: 0.0.40
codegen_flags: <defaults>
</compile_context>

<pallas_src>
import math
import functools

import jax
import jax.numpy as jnp
from jax import lax
from jax.experimental import pallas as pl
from jax.experimental.pallas import tpu as pltpu

LOG2 = math.log(2.0)
LANE = 128                              # TPU vreg lane width
VMEM_LIMIT_BYTES = 32 * 1024 * 1024     # safe on v7x (64 MiB phys); only raise
                                        # toward 64-100 MiB on v5e/v6e sweeps
MLP_TILE_ROWS = 2048                    # row tile for the fused MLP kernels
SEG_TILE_M = 256                        # segment-row tile for segment-mean
SEG_TILE_K = 1024                       # source-row tile (multiple of 128)
STATE_PALLAS_MIN_ROWS = 64              # below this, state path runs in XLA


def _cdiv(a, b):
    return -(-a // b)


def _round_up(x, m):
    return _cdiv(x, m) * m


def _pad_rows(x, rows):
    if int(x.shape[0]) == rows:
        return x
    return jnp.pad(x, ((0, rows - int(x.shape[0])), (0, 0)))


def _pad_lanes(x, lanes):
    d = int(x.shape[1])
    if d == lanes:
        return x
    return jnp.pad(x, ((0, 0), (0, lanes - d)))


def _pick_row_tile(m, tile_rows):
    # >=2 blocks along the 'parallel' row axis whenever m allows (v7x has two
    # TensorCores), capped by tile_rows for VMEM.
    tm = min(int(tile_rows), _round_up(_cdiv(m, 2), 16))
    return max(tm, 16)


def _softplus2(z):
    # Numerically stable log(exp(z) + 1) - log(2); computed in f32 (only the
    # MXU operands are bf16 -- v5e has no bf16 vector/EUP math).
    return jnp.maximum(z, 0.0) + jnp.log1p(jnp.exp(-jnp.abs(z))) - LOG2


# ----------------------------------------------------------------------------
# Fused multi-input MLP kernel:
#   y = sp2( ... sp2( concat_lanes(x_i) @ W0 + b0 ) @ W1 + b1 ... )
# Every feature dim is zero-padded to a multiple of 128 lanes, so each matmul
# is lane-dense and the final store is an unmasked vst.  All intermediates
# stay in VMEM/vregs.
# ----------------------------------------------------------------------------
def _make_mlp_kernel(n_in, n_layers):
    def kernel(*refs):
        xs = refs[:n_in]
        p = refs[n_in:-1]
        o_ref = refs[-1]

        if n_in == 1:
            x = xs[0][...]
        else:
            # lane-dim concat of 128-lane-padded inputs -> one K=n_in*128 push
            x = jnp.concatenate([r[...] for r in xs], axis=-1)

        z = jnp.dot(x, p[0][...], preferred_element_type=jnp.float32) + p[1][...]
        z = _softplus2(z)
        for l in range(1, n_layers):
            z = jnp.dot(z.astype(jnp.bfloat16), p[2 * l][...],
                        preferred_element_type=jnp.float32) + p[2 * l + 1][...]
            z = _softplus2(z)

        o_ref[...] = z.astype(o_ref.dtype)

    return kernel


def fused_mlp(xs, in_dims, layers, *, out_dtype=jnp.float32,
              tile_rows=MLP_TILE_ROWS):
    """Apply the full Linear+SoftPlus2 chain to concat(xs, axis=1) in one
    pallas_call.  `xs` are lane-padded (multiple of 128) inputs whose real
    widths are `in_dims`.  Returns the lane-padded output
    [m, round_up(d_out, 128)]; pad lanes are exactly 0."""
    m = int(xs[0].shape[0])
    n_in = len(xs)
    n_layers = len(layers)
    hp_in = [int(x.shape[1]) for x in xs]
    assert all(hp % LANE == 0 for hp in hp_in)

    d_real = [sum(in_dims)] + [int(w.shape[1]) for (w, _) in layers]
    d_pad = [sum(hp_in)] + [_round_up(d, LANE) for d in d_real[1:]]

    # First layer: split into per-input slabs, zero-pad each slab's rows to
    # its input's padded lane count and its columns to the padded layer
    # width, then re-stack so one lane-dense matmul replaces the split
    # accumulation.
    w0, b0 = layers[0]
    assert int(w0.shape[0]) == sum(in_dims)
    slabs, off = [], 0
    for k, hp in zip(in_dims, hp_in):
        slabs.append(jnp.pad(w0[off:off + k],
                             ((0, hp - k), (0, d_pad[1] - d_real[1]))))
        off += k
    w_args = [
        jnp.concatenate(slabs, axis=0).astype(jnp.bfloat16),
        jnp.pad(b0, (0, d_pad[1] - d_real[1])).reshape(1, -1).astype(jnp.float32),
    ]
    for l, (w, b) in enumerate(layers[1:], start=1):
        w_args.append(jnp.pad(
            w, ((0, d_pad[l] - d_real[l]),
                (0, d_pad[l + 1] - d_real[l + 1]))).astype(jnp.bfloat16))
        w_args.append(jnp.pad(
            b, (0, d_pad[l + 1] - d_real[l + 1])).reshape(1, -1).astype(jnp.float32))

    tm = _pick_row_tile(m, tile_rows)
    m_pad = _round_up(m, tm)
    xs_p = [_pad_rows(x, m_pad).astype(jnp.bfloat16) for x in xs]

    in_specs = [pl.BlockSpec((tm, hp), lambda i: (i, 0)) for hp in hp_in]
    in_specs += [pl.BlockSpec(tuple(int(d) for d in a.shape), lambda i: (0, 0))
                 for a in w_args]
    out_spec = pl.BlockSpec((tm, d_pad[-1]), lambda i: (i, 0))

    flops = 2 * m_pad * sum(d_pad[l] * d_pad[l + 1] for l in range(n_layers))
    transcendentals = 2 * m_pad * sum(d_pad[1:])     # exp + log1p per element
    bytes_accessed = (sum(m_pad * hp * 2 for hp in hp_in)
                      + sum(int(a.size) * a.dtype.itemsize for a in w_args)
                      + m_pad * d_pad[-1] * jnp.dtype(out_dtype).itemsize)

    out = pl.pallas_call(
        _make_mlp_kernel(n_in, n_layers),
        out_shape=jax.ShapeDtypeStruct((m_pad, d_pad[-1]), out_dtype),
        grid=(m_pad // tm,),
        in_specs=in_specs,
        out_specs=out_spec,
        compiler_params=pltpu.CompilerParams(
            dimension_semantics=("parallel",),
            vmem_limit_bytes=VMEM_LIMIT_BYTES),
        cost_estimate=pl.CostEstimate(
            flops=int(flops), transcendentals=int(transcendentals),
            bytes_accessed=int(bytes_accessed)),
    )(*xs_p, *w_args)
    return out[:m] if m_pad != m else out


# ----------------------------------------------------------------------------
# Segment mean with in-kernel bf16 one-hot (never materialized in HBM):
#   out[g] = mean_{r : ids[r] == g} x[r]     (0 for empty segments)
# Inverse degrees are precomputed once in XLA and streamed in as [tm,1];
# no per-K-step count accumulation or cross-lane reduce.
# Grid = (segment tiles [parallel], source-row tiles [arbitrary/reduction]).
# ----------------------------------------------------------------------------
def _segmean_kernel(ids_ref, inv_ref, x_ref, o_ref, acc_ref):
    k = pl.program_id(1)

    @pl.when(k == 0)
    def _():
        acc_ref[...] = jnp.zeros_like(acc_ref)

    tm = acc_ref.shape[0]
    tk = x_ref.shape[0]
    # Subtract the segment-tile base from the [1,tk] ids (cheap) rather than
    # adding it to the [tm,tk] iota; build the one-hot directly in bf16.
    ids_local = ids_ref[...] - pl.program_id(0) * tm            # [1, tk]
    row_ids = lax.broadcasted_iota(jnp.int32, (tm, tk), 0)
    onehot = (row_ids == ids_local).astype(jnp.bfloat16)        # [tm, tk]
    acc_ref[...] += jnp.dot(onehot, x_ref[...],
                            preferred_element_type=jnp.float32)

    @pl.when(k == pl.num_programs(1) - 1)
    def _():
        o_ref[...] = (acc_ref[...] * inv_ref[...]).astype(o_ref.dtype)


def segment_mean(seg_ids, x, num_segments, *, out_dtype=jnp.bfloat16,
                 tile_m=SEG_TILE_M, tile_k=SEG_TILE_K):
    """Mean of x rows per segment.  x must be lane-padded (multiple of 128)."""
    n_rows, dp = int(x.shape[0]), int(x.shape[1])
    assert dp % LANE == 0

    tm = max(16, min(int(tile_m), _round_up(_cdiv(num_segments, 2), 16)))
    m_pad = _round_up(num_segments, tm)
    tk = min(_round_up(n_rows, LANE), int(tile_k))
    k_pad = _round_up(n_rows, tk)

    x_p = _pad_rows(x, k_pad).astype(jnp.bfloat16)
    ids_p = jnp.pad(seg_ids.astype(jnp.int32), (0, k_pad - n_rows),
                    constant_values=-1).reshape(1, k_pad)

    # Degrees are invariant across the layer: compute inverse degrees once in
    # XLA instead of re-accumulating counts per (segment tile x K tile).
    deg = jax.ops.segment_sum(jnp.ones((n_rows,), jnp.float32),
                              seg_ids, num_segments=num_segments)
    inv = (1.0 / jnp.maximum(deg, 1.0)).reshape(num_segments, 1)
    inv_p = _pad_rows(inv, m_pad)

    n_seg_tiles = m_pad // tm
    cost = pl.CostEstimate(
        flops=int(2 * m_pad * k_pad * dp),
        transcendentals=0,
        bytes_accessed=int(n_seg_tiles * (k_pad * dp * 2 + k_pad * 4)
                           + m_pad * 4
                           + m_pad * dp * jnp.dtype(out_dtype).itemsize))

    out = pl.pallas_call(
        _segmean_kernel,
        out_shape=jax.ShapeDtypeStruct((m_pad, dp), out_dtype),
        grid=(n_seg_tiles, k_pad // tk),
        in_specs=[pl.BlockSpec((1, tk), lambda i, k: (0, k)),
                  pl.BlockSpec((tm, 1), lambda i, k: (i, 0)),
                  pl.BlockSpec((tk, dp), lambda i, k: (k, 0))],
        out_specs=pl.BlockSpec((tm, dp), lambda i, k: (i, 0)),
        scratch_shapes=[pltpu.VMEM((tm, dp), jnp.float32)],
        compiler_params=pltpu.CompilerParams(
            dimension_semantics=("parallel", "arbitrary"),
            vmem_limit_bytes=VMEM_LIMIT_BYTES),
        cost_estimate=cost,
    )(ids_p, inv_p, x_p)
    return out[:num_segments] if m_pad != num_segments else out


# ----------------------------------------------------------------------------
# Plain-XLA fallbacks for the tiny-B state path (launch cost >> compute).
# ----------------------------------------------------------------------------
def _xla_mlp(x, layers):
    for (w, b) in layers:
        x = _softplus2(jnp.dot(x, w, precision=lax.Precision.HIGHEST) + b)
    return x


def _xla_segmean(ids, x, num_segments):
    ssum = jax.ops.segment_sum(x, ids, num_segments=num_segments)
    cnt = jax.ops.segment_sum(jnp.ones((x.shape[0],), x.dtype), ids,
                              num_segments=num_segments)
    return ssum / jnp.maximum(cnt, 1.0)[:, None]


# ----------------------------------------------------------------------------
# Parameter initialization (deterministic, PyTorch-Linear-like uniform)
# ----------------------------------------------------------------------------
def init_linear(key, fan_in, fan_out):
    kw, kb = jax.random.split(key)
    bound = 1.0 / math.sqrt(fan_in)
    w = jax.random.uniform(kw, (fan_in, fan_out), jnp.float32, -bound, bound)
    b = jax.random.uniform(kb, (fan_out,), jnp.float32, -bound, bound)
    return (w, b)


def init_mlp(key, dims):
    keys = jax.random.split(key, len(dims) - 1)
    return [init_linear(k, dims[i], dims[i + 1]) for i, k in enumerate(keys)]


def init_megnet_params(key, hidden):
    ks = jax.random.split(key, 6)
    return {
        "node_func": init_mlp(ks[0], [hidden, 2 * hidden, hidden]),
        "edge_func": init_mlp(ks[1], [hidden, 2 * hidden, hidden]),
        "state_func": init_mlp(ks[2], [hidden, 2 * hidden, hidden]),
        "node_update": init_mlp(ks[3], [3 * hidden, 2 * hidden, 2 * hidden, hidden]),
        "edge_update": init_mlp(ks[4], [4 * hidden, 2 * hidden, 2 * hidden, hidden]),
        "state_update": init_mlp(ks[5], [3 * hidden, 2 * hidden, 2 * hidden, hidden]),
    }


# ----------------------------------------------------------------------------
# MEGNETLayer forward (batch_norm=False, residual=False, dropout=0.0)
# ----------------------------------------------------------------------------
def megnet_layer_forward(params, h, e, s, src, dst, node_gid, edge_gid,
                         num_nodes, num_edges, num_graphs):
    H = int(h.shape[1])
    HP = _round_up(H, LANE)

    h_p = _pad_lanes(h, HP)
    e_p = _pad_lanes(e, HP)

    # per-item feature MLPs: lane-padded bf16 outputs (feed further kernels)
    h1 = fused_mlp([h_p], [H], params["node_func"], out_dtype=jnp.bfloat16)   # [N,HP]
    e1 = fused_mlp([e_p], [H], params["edge_func"], out_dtype=jnp.bfloat16)   # [E,HP]

    use_pallas_state = num_graphs >= STATE_PALLAS_MIN_ROWS
    if use_pallas_state:
        s1 = fused_mlp([_pad_lanes(s, HP)], [H], params["state_func"],
                       out_dtype=jnp.bfloat16)                                # [B,HP]
        s1_real = None
    else:
        # tiny B: keep the state path in XLA (kernel launch >> compute)
        s1_real = _xla_mlp(s, params["state_func"])                           # [B,H]
        s1 = _pad_lanes(s1_real, HP).astype(jnp.bfloat16)                     # [B,HP]

    # dgl.broadcast_nodes + per-edge row gathers (cheap XLA takes)
    n_s = s1[node_gid]                                                        # [N,HP]
    h_src, h_dst, ns_src = h1[src], h1[dst], n_s[src]                         # [E,HP]

    # edge update: cat([h_src, h_dst, e, n_s_src]) -> one lane-dense K=4*128
    # matmul against the stacked, zero-padded W0 (no [E,4H] HBM buffer).
    e_new_p = fused_mlp([h_src, h_dst, e1, ns_src], [H, H, H, H],
                        params["edge_update"], out_dtype=jnp.float32)         # [E,HP]

    # node update: mean of incoming edge features (one-hot built in-kernel)
    hh = segment_mean(dst, e_new_p, num_nodes, out_dtype=jnp.bfloat16)        # [N,HP]
    h_new_p = fused_mlp([hh, h1, n_s], [H, H, H], params["node_update"],
                        out_dtype=jnp.float32)                                # [N,HP]

    # state update: per-graph means of edge / node features
    if use_pallas_state:
        u_edge = segment_mean(edge_gid, e_new_p, num_graphs, out_dtype=jnp.bfloat16)
        u_node = segment_mean(node_gid, h_new_p, num_graphs, out_dtype=jnp.bfloat16)
        s_new = fused_mlp([s1, u_edge, u_node], [H, H, H],
                          params["state_update"], out_dtype=jnp.float32)[:, :H]
    else:
        u_edge = _xla_segmean(edge_gid, e_new_p[:, :H], num_graphs)
        u_node = _xla_segmean(node_gid, h_new_p[:, :H], num_graphs)
        s_new = _xla_mlp(jnp.concatenate([s1_real, u_edge, u_node], axis=1),
                         params["state_update"])

    # residual=False, dropout=0.0, batch_norm=False -> identity
    return h_new_p[:, :H], e_new_p[:, :H], s_new


# ----------------------------------------------------------------------------
# Pure-JAX f32 reference (for a sanity check)
# ----------------------------------------------------------------------------
def _ref_mlp(x, params):
    for (w, b) in params:
        z = jnp.dot(x, w, precision=lax.Precision.HIGHEST) + b
        x = jax.nn.softplus(z) - LOG2
    return x


def megnet_ref(params, h, e, s, src, dst, node_gid, edge_gid, N, E, B):
    h = _ref_mlp(h, params["node_func"])
    e = _ref_mlp(e, params["edge_func"])
    s = _ref_mlp(s, params["state_func"])
    n_s = s[node_gid]
    m_in = jnp.concatenate([h[src], h[dst], e, n_s[src]], axis=1)
    e_new = _ref_mlp(m_in, params["edge_update"])
    seg_sum = jax.ops.segment_sum(e_new, dst, num_segments=N)
    deg = jnp.maximum(jax.ops.segment_sum(jnp.ones((E,)), dst, num_segments=N), 1.0)
    hh = seg_sum / deg[:, None]
    h_new = _ref_mlp(jnp.concatenate([hh, h, n_s], axis=1), params["node_update"])
    u_edge = jax.ops.segment_sum(e_new, edge_gid, num_segments=B) / jnp.maximum(
        jax.ops.segment_sum(jnp.ones((E,)), edge_gid, num_segments=B), 1.0)[:, None]
    u_node = jax.ops.segment_sum(h_new, node_gid, num_segments=B) / jnp.maximum(
        jax.ops.segment_sum(jnp.ones((N,)), node_gid, num_segments=B), 1.0)[:, None]
    s_new = _ref_mlp(jnp.concatenate([s, u_edge, u_node], axis=1), params["state_update"])
    return h_new, e_new, s_new


# ----------------------------------------------------------------------------
if __name__ == "__main__":
    hidden = 32
    num_graphs = 2
    # Small batched graph: graph 0 has 5 nodes / 10 edges, graph 1 has 3 nodes / 6 edges
    node_gid = jnp.array([0, 0, 0, 0, 0, 1, 1, 1], dtype=jnp.int32)        # [N]
    src = jnp.array([0, 1, 2, 3, 4, 0, 2, 1, 4, 3, 5, 6, 7, 5, 7, 6], dtype=jnp.int32)
    dst = jnp.array([1, 2, 3, 4, 0, 2, 0, 3, 1, 2, 6, 7, 5, 7, 6, 5], dtype=jnp.int32)
    edge_gid = node_gid[src]                                               # [E]
    N, E, B = node_gid.shape[0], src.shape[0], num_graphs

    key = jax.random.PRNGKey(0)
    kp, kh, ke, ks = jax.random.split(key, 4)
    params = init_megnet_params(kp, hidden)
    h = jax.random.normal(kh, (N, hidden), dtype=jnp.float32)
    e = jax.random.normal(ke, (E, hidden), dtype=jnp.float32)
    s = jax.random.normal(ks, (B, hidden), dtype=jnp.float32)

    fwd = jax.jit(functools.partial(
        megnet_layer_forward,
        num_nodes=N, num_edges=E, num_graphs=B))
    h_out, e_out, s_out = fwd(params, h, e, s, src, dst, node_gid, edge_gid)
    jax.block_until_ready((h_out, e_out, s_out))

    assert h_out.shape == (N, hidden)
    assert e_out.shape == (E, hidden)
    assert s_out.shape == (B, hidden)
    assert bool(jnp.all(jnp.isfinite(h_out)))
    assert bool(jnp.all(jnp.isfinite(e_out)))
    assert bool(jnp.all(jnp.isfinite(s_out)))

    # Sanity check vs. pure-JAX f32 reference.  Tolerance is loosened because
    # the kernels feed bf16 into the MXU (f32 accumulation).
    h_ref, e_ref, s_ref = megnet_ref(params, h, e, s, src, dst,
                                     node_gid, edge_gid, N, E, B)
    for a, b in ((h_out, h_ref), (e_out, e_ref), (s_out, s_ref)):
        assert bool(jnp.max(jnp.abs(a - b)) < 1e-1), "mismatch vs reference"

    print("KERNEL_OK")
</pallas_src>

<mosaic_0001>
module attributes {stable_mosaic.version = 11 : i64} {
  func.func private @main(%arg0: i32) attributes {dimension_semantics = [#tpu.dimension_semantics<core_parallel>], iteration_bounds = array<i64: 2>, tpu.core_type = #tpu.core_type<sc_scalar_subcore>, window_params = []} {
    return
  }
}

module attributes {stable_mosaic.version = 11 : i64} {
  func.func private @main(%arg0: i32) attributes {dimension_semantics = [#tpu.dimension_semantics<core_parallel>], iteration_bounds = array<i64: 2>, tpu.core_type = #tpu.core_type<sc_scalar_subcore>, window_params = []} {
    return
  }
}

module attributes {stable_mosaic.version = 11 : i64} {
  func.func @kernel(%arg0: i32, %arg1: memref<16x128xbf16, #tpu.memory_space<vmem>>, %arg2: memref<128x128xbf16, #tpu.memory_space<vmem>>, %arg3: memref<1x128xf32, #tpu.memory_space<vmem>>, %arg4: memref<128x128xbf16, #tpu.memory_space<vmem>>, %arg5: memref<1x128xf32, #tpu.memory_space<vmem>>, %arg6: memref<16x128xbf16, #tpu.memory_space<vmem>>) attributes {dimension_semantics = [#tpu.dimension_semantics<parallel>], iteration_bounds = array<i64: 1>, scalar_prefetch = 0 : i64, scratch_operands = 0 : i64, tpu.core_type = #tpu.core_type<tc>, window_params = [{transform_indices = @transform_0, window_bounds = array<i64: 16, 128>}, {pipeline_mode = #tpu.pipeline_mode<synchronous>, transform_indices = @transform_1, window_bounds = array<i64: 128, 128>}, {pipeline_mode = #tpu.pipeline_mode<synchronous>, transform_indices = @transform_2, window_bounds = array<i64: 1, 128>}, {pipeline_mode = #tpu.pipeline_mode<synchronous>, transform_indices = @transform_3, window_bounds = array<i64: 128, 128>}, {pipeline_mode = #tpu.pipeline_mode<synchronous>, transform_indices = @transform_4, window_bounds = array<i64: 1, 128>}, {transform_indices = @transform_5, window_bounds = array<i64: 16, 128>}]} {
    %c0 = arith.constant 0 : index
    %c0_0 = arith.constant 0 : index
    %0 = vector.load %arg1[%c0, %c0_0] : memref<16x128xbf16, #tpu.memory_space<vmem>>, vector<16x128xbf16>
    %c0_1 = arith.constant 0 : index
    %c0_2 = arith.constant 0 : index
    %1 = vector.load %arg2[%c0_1, %c0_2] : memref<128x128xbf16, #tpu.memory_space<vmem>>, vector<128x128xbf16>
    %cst = arith.constant dense<0.000000e+00> : vector<16x128xf32>
    %2 = tpu.matmul %0, %1, %cst {dimension_numbers = #tpu.dot_dimension_numbers<[1], [0], [0], [1], [0, 0, 1, 1], [], []>} : vector<16x128xbf16>, vector<128x128xbf16>, vector<16x128xf32> -> vector<16x128xf32>
    %c0_3 = arith.constant 0 : index
    %c0_4 = arith.constant 0 : index
    %3 = vector.load %arg3[%c0_3, %c0_4] : memref<1x128xf32, #tpu.memory_space<vmem>>, vector<1x128xf32>
    %4 = vector.broadcast %3 : vector<1x128xf32> to vector<16x128xf32>
    %5 = arith.addf %2, %4 : vector<16x128xf32>
    %cst_5 = arith.constant 0.000000e+00 : f32
    %6 = vector.broadcast %cst_5 : f32 to vector<16x128xf32>
    %7 = arith.maximumf %5, %6 : vector<16x128xf32>
    %8 = math.absf %5 : vector<16x128xf32>
    %cst_6 = arith.constant 0.000000e+00 : f32
    %9 = vector.broadcast %cst_6 : f32 to vector<16x128xf32>
    %10 = arith.subf %9, %8 : vector<16x128xf32>
    %11 = math.exp %10 : vector<16x128xf32>
    %12 = math.log1p %11 : vector<16x128xf32>
    %13 = arith.addf %7, %12 : vector<16x128xf32>
    %cst_7 = arith.constant 0.693147182 : f32
    %14 = vector.broadcast %cst_7 : f32 to vector<16x128xf32>
    %15 = arith.subf %13, %14 : vector<16x128xf32>
    %16 = arith.truncf %15 : vector<16x128xf32> to vector<16x128xbf16>
    %c0_8 = arith.constant 0 : index
    %c0_9 = arith.constant 0 : index
    %17 = vector.load %arg4[%c0_8, %c0_9] : memref<128x128xbf16, #tpu.memory_space<vmem>>, vector<128x128xbf16>
    %cst_10 = arith.constant dense<0.000000e+00> : vector<16x128xf32>
    %18 = tpu.matmul %16, %17, %cst_10 {dimension_numbers = #tpu.dot_dimension_numbers<[1], [0], [0], [1], [0, 0, 1, 1], [], []>} : vector<16x128xbf16>, vector<128x128xbf16>, vector<16x128xf32> -> vector<16x128xf32>
    %c0_11 = arith.constant 0 : index
    %c0_12 = arith.constant 0 : index
    %19 = vector.load %arg5[%c0_11, %c0_12] : memref<1x128xf32, #tpu.memory_space<vmem>>, vector<1x128xf32>
    %20 = vector.broadcast %19 : vector<1x128xf32> to vector<16x128xf32>
    %21 = arith.addf %18, %20 : vector<16x128xf32>
    %cst_13 = arith.constant 0.000000e+00 : f32
    %22 = vector.broadcast %cst_13 : f32 to vector<16x128xf32>
    %23 = arith.maximumf %21, %22 : vector<16x128xf32>
    %24 = math.absf %21 : vector<16x128xf32>
    %cst_14 = arith.constant 0.000000e+00 : f32
    %25 = vector.broadcast %cst_14 : f32 to vector<16x128xf32>
    %26 = arith.subf %25, %24 : vector<16x128xf32>
    %27 = math.exp %26 : vector<16x128xf32>
    %28 = math.log1p %27 : vector<16x128xf32>
    %29 = arith.addf %23, %28 : vector<16x128xf32>
    %cst_15 = arith.constant 0.693147182 : f32
    %30 = vector.broadcast %cst_15 : f32 to vector<16x128xf32>
    %31 = arith.subf %29, %30 : vector<16x128xf32>
    %32 = arith.truncf %31 : vector<16x128xf32> to vector<16x128xbf16>
    %c0_16 = arith.constant 0 : index
    %c0_17 = arith.constant 0 : index
    %33 = vector.load %arg6[%c0_16, %c0_17] : memref<16x128xbf16, #tpu.memory_space<vmem>>, vector<16x128xbf16>
    tpu.vector_store %arg6[%c0_16, %c0_17], %32 {strides = array<i32>} : memref<16x128xbf16, #tpu.memory_space<vmem>>, vector<16x128xbf16>,
    return
  }
  func.func @transform_0(%arg0: i32) -> (i32, i32) {
    %c0_i32 = arith.constant 0 : i32
    %c0_i32_0 = arith.constant 0 : i32
    return %arg0, %c0_i32 : i32, i32
  }
  func.func @transform_1(%arg0: i32) -> (i32, i32) {
    %c0_i32 = arith.constant 0 : i32
    %c0_i32_0 = arith.constant 0 : i32
    %c0_i32_1 = arith.constant 0 : i32
    return %c0_i32, %c0_i32_0 : i32, i32
  }
  func.func @transform_2(%arg0: i32) -> (i32, i32) {
    %c0_i32 = arith.constant 0 : i32
    %c0_i32_0 = arith.constant 0 : i32
    %c0_i32_1 = arith.constant 0 : i32
    return %c0_i32, %c0_i32_0 : i32, i32
  }
  func.func @transform_3(%arg0: i32) -> (i32, i32) {
    %c0_i32 = arith.constant 0 : i32
    %c0_i32_0 = arith.constant 0 : i32
    %c0_i32_1 = arith.constant 0 : i32
    return %c0_i32, %c0_i32_0 : i32, i32
  }
  func.func @transform_4(%arg0: i32) -> (i32, i32) {
    %c0_i32 = arith.constant 0 : i32
    %c0_i32_0 = arith.constant 0 : i32
    %c0_i32_1 = arith.constant 0 : i32
    return %c0_i32, %c0_i32_0 : i32, i32
  }
  func.func @transform_5(%arg0: i32) -> (i32, i32) {
    %c0_i32 = arith.constant 0 : i32
    %c0_i32_0 = arith.constant 0 : i32
    return %arg0, %c0_i32 : i32, i32
  }
}

module attributes {stable_mosaic.version = 11 : i64} {
  func.func @kernel(%arg0: i32, %arg1: memref<16x128xbf16, #tpu.memory_space<vmem>>, %arg2: memref<16x128xbf16, #tpu.memory_space<vmem>>, %arg3: memref<16x128xbf16, #tpu.memory_space<vmem>>, %arg4: memref<16x128xbf16, #tpu.memory_space<vmem>>, %arg5: memref<512x128xbf16, #tpu.memory_space<vmem>>, %arg6: memref<1x128xf32, #tpu.memory_space<vmem>>, %arg7: memref<128x128xbf16, #tpu.memory_space<vmem>>, %arg8: memref<1x128xf32, #tpu.memory_space<vmem>>, %arg9: memref<128x128xbf16, #tpu.memory_space<vmem>>, %arg10: memref<1x128xf32, #tpu.memory_space<vmem>>, %arg11: memref<16x128xf32, #tpu.memory_space<vmem>>) attributes {dimension_semantics = [#tpu.dimension_semantics<parallel>], iteration_bounds = array<i64: 1>, scalar_prefetch = 0 : i64, scratch_operands = 0 : i64, tpu.core_type = #tpu.core_type<tc>, window_params = [{transform_indices = @transform_0, window_bounds = array<i64: 16, 128>}, {transform_indices = @transform_1, window_bounds = array<i64: 16, 128>}, {transform_indices = @transform_2, window_bounds = array<i64: 16, 128>}, {transform_indices = @transform_3, window_bounds = array<i64: 16, 128>}, {pipeline_mode = #tpu.pipeline_mode<synchronous>, transform_indices = @transform_4, window_bounds = array<i64: 512, 128>}, {pipeline_mode = #tpu.pipeline_mode<synchronous>, transform_indices = @transform_5, window_bounds = array<i64: 1, 128>}, {pipeline_mode = #tpu.pipeline_mode<synchronous>, transform_indices = @transform_6, window_bounds = array<i64: 128, 128>}, {pipeline_mode = #tpu.pipeline_mode<synchronous>, transform_indices = @transform_7, window_bounds = array<i64: 1, 128>}, {pipeline_mode = #tpu.pipeline_mode<synchronous>, transform_indices = @transform_8, window_bounds = array<i64: 128, 128>}, {pipeline_mode = #tpu.pipeline_mode<synchronous>, transform_indices = @transform_9, window_bounds = array<i64: 1, 128>}, {transform_indices = @transform_10, window_bounds = array<i64: 16, 128>}]} {
    %c0 = arith.constant 0 : index
    %c0_0 = arith.constant 0 : index
    %0 = vector.load %arg1[%c0, %c0_0] : memref<16x128xbf16, #tpu.memory_space<vmem>>, vector<16x128xbf16>
    %c0_1 = arith.constant 0 : index
    %c0_2 = arith.constant 0 : index
    %1 = vector.load %arg2[%c0_1, %c0_2] : memref<16x128xbf16, #tpu.memory_space<vmem>>, vector<16x128xbf16>
    %c0_3 = arith.constant 0 : index
    %c0_4 = arith.constant 0 : index
    %2 = vector.load %arg3[%c0_3, %c0_4] : memref<16x128xbf16, #tpu.memory_space<vmem>>, vector<16x128xbf16>
    %c0_5 = arith.constant 0 : index
    %c0_6 = arith.constant 0 : index
    %3 = vector.load %arg4[%c0_5, %c0_6] : memref<16x128xbf16, #tpu.memory_space<vmem>>, vector<16x128xbf16>
    %4 = tpu.concatenate %0, %1, %2, %3 in 1 : vector<16x128xbf16>, vector<16x128xbf16>, vector<16x128xbf16>, vector<16x128xbf16> -> vector<16x512xbf16>
    %c0_7 = arith.constant 0 : index
    %c0_8 = arith.constant 0 : index
    %5 = vector.load %arg5[%c0_7, %c0_8] : memref<512x128xbf16, #tpu.memory_space<vmem>>, vector<512x128xbf16>
    %cst = arith.constant dense<0.000000e+00> : vector<16x128xf32>
    %6 = tpu.matmul %4, %5, %cst {dimension_numbers = #tpu.dot_dimension_numbers<[1], [0], [0], [1], [0, 0, 1, 1], [], []>} : vector<16x512xbf16>, vector<512x128xbf16>, vector<16x128xf32> -> vector<16x128xf32>
    %c0_9 = arith.constant 0 : index
    %c0_10 = arith.constant 0 : index
    %7 = vector.load %arg6[%c0_9, %c0_10] : memref<1x128xf32, #tpu.memory_space<vmem>>, vector<1x128xf32>
    %8 = vector.broadcast %7 : vector<1x128xf32> to vector<16x128xf32>
    %9 = arith.addf %6, %8 : vector<16x128xf32>
    %cst_11 = arith.constant 0.000000e+00 : f32
    %10 = vector.broadcast %cst_11 : f32 to vector<16x128xf32>
    %11 = arith.maximumf %9, %10 : vector<16x128xf32>
    %12 = math.absf %9 : vector<16x128xf32>
    %cst_12 = arith.constant 0.000000e+00 : f32
    %13 = vector.broadcast %cst_12 : f32 to vector<16x128xf32>
    %14 = arith.subf %13, %12 : vector<16x128xf32>
    %15 = math.exp %14 : vector<16x128xf32>
    %16 = math.log1p %15 : vector<16x128xf32>
    %17 = arith.addf %11, %16 : vector<16x128xf32>
    %cst_13 = arith.constant 0.693147182 : f32
    %18 = vector.broadcast %cst_13 : f32 to vector<16x128xf32>
    %19 = arith.subf %17, %18 : vector<16x128xf32>
    %20 = arith.truncf %19 : vector<16x128xf32> to vector<16x128xbf16>
    %c0_14 = arith.constant 0 : index
    %c0_15 = arith.constant 0 : index
    %21 = vector.load %arg7[%c0_14, %c0_15] : memref<128x128xbf16, #tpu.memory_space<vmem>>, vector<128x128xbf16>
    %cst_16 = arith.constant dense<0.000000e+00> : vector<16x128xf32>
    %22 = tpu.matmul %20, %21, %cst_16 {dimension_numbers = #tpu.dot_dimension_numbers<[1], [0], [0], [1], [0, 0, 1, 1], [], []>} : vector<16x128xbf16>, vector<128x128xbf16>, vector<16x128xf32> -> vector<16x128xf32>
    %c0_17 = arith.constant 0 : index
    %c0_18 = arith.constant 0 : index
    %23 = vector.load %arg8[%c0_17, %c0_18] : memref<1x128xf32, #tpu.memory_space<vmem>>, vector<1x128xf32>
    %24 = vector.broadcast %23 : vector<1x128xf32> to vector<16x128xf32>
    %25 = arith.addf %22, %24 : vector<16x128xf32>
    %cst_19 = arith.constant 0.000000e+00 : f32
    %26 = vector.broadcast %cst_19 : f32 to vector<16x128xf32>
    %27 = arith.maximumf %25, %26 : vector<16x128xf32>
    %28 = math.absf %25 : vector<16x128xf32>
    %cst_20 = arith.constant 0.000000e+00 : f32
    %29 = vector.broadcast %cst_20 : f32 to vector<16x128xf32>
    %30 = arith.subf %29, %28 : vector<16x128xf32>
    %31 = math.exp %30 : vector<16x128xf32>
    %32 = math.log1p %31 : vector<16x128xf32>
    %33 = arith.addf %27, %32 : vector<16x128xf32>
    %cst_21 = arith.constant 0.693147182 : f32
    %34 = vector.broadcast %cst_21 : f32 to vector<16x128xf32>
    %35 = arith.subf %33, %34 : vector<16x128xf32>
    %36 = arith.truncf %35 : vector<16x128xf32> to vector<16x128xbf16>
    %c0_22 = arith.constant 0 : index
    %c0_23 = arith.constant 0 : index
    %37 = vector.load %arg9[%c0_22, %c0_23] : memref<128x128xbf16, #tpu.memory_space<vmem>>, vector<128x128xbf16>
    %cst_24 = arith.constant dense<0.000000e+00> : vector<16x128xf32>
    %38 = tpu.matmul %36, %37, %cst_24 {dimension_numbers = #tpu.dot_dimension_numbers<[1], [0], [0], [1], [0, 0, 1, 1], [], []>} : vector<16x128xbf16>, vector<128x128xbf16>, vector<16x128xf32> -> vector<16x128xf32>
    %c0_25 = arith.constant 0 : index
    %c0_26 = arith.constant 0 : index
    %39 = vector.load %arg10[%c0_25, %c0_26] : memref<1x128xf32, #tpu.memory_space<vmem>>, vector<1x128xf32>
    %40 = vector.broadcast %39 : vector<1x128xf32> to vector<16x128xf32>
    %41 = arith.addf %38, %40 : vector<16x128xf32>
    %cst_27 = arith.constant 0.000000e+00 : f32
    %42 = vector.broadcast %cst_27 : f32 to vector<16x128xf32>
    %43 = arith.maximumf %41, %42 : vector<16x128xf32>
    %44 = math.absf %41 : vector<16x128xf32>
    %cst_28 = arith.constant 0.000000e+00 : f32
    %45 = vector.broadcast %cst_28 : f32 to vector<16x128xf32>
    %46 = arith.subf %45, %44 : vector<16x128xf32>
    %47 = math.exp %46 : vector<16x128xf32>
    %48 = math.log1p %47 : vector<16x128xf32>
    %49 = arith.addf %43, %48 : vector<16x128xf32>
    %cst_29 = arith.constant 0.693147182 : f32
    %50 = vector.broadcast %cst_29 : f32 to vector<16x128xf32>
    %51 = arith.subf %49, %50 : vector<16x128xf32>
    %c0_30 = arith.constant 0 : index
    %c0_31 = arith.constant 0 : index
    %52 = vector.load %arg11[%c0_30, %c0_31] : memref<16x128xf32, #tpu.memory_space<vmem>>, vector<16x128xf32>
    tpu.vector_store %arg11[%c0_30, %c0_31], %51 {strides = array<i32>} : memref<16x128xf32, #tpu.memory_space<vmem>>, vector<16x128xf32>,
    return
  }
  func.func @transform_0(%arg0: i32) -> (i32, i32) {
    %c0_i32 = arith.constant 0 : i32
    %c0_i32_0 = arith.constant 0 : i32
    return %arg0, %c0_i32 : i32, i32
  }
  func.func @transform_1(%arg0: i32) -> (i32, i32) {
    %c0_i32 = arith.constant 0 : i32
    %c0_i32_0 = arith.constant 0 : i32
    return %arg0, %c0_i32 : i32, i32
  }
  func.func @transform_2(%arg0: i32) -> (i32, i32) {
    %c0_i32 = arith.constant 0 : i32
    %c0_i32_0 = arith.constant 0 : i32
    return %arg0, %c0_i32 : i32, i32
  }
  func.func @transform_3(%arg0: i32) -> (i32, i32) {
    %c0_i32 = arith.constant 0 : i32
    %c0_i32_0 = arith.constant 0 : i32
    return %arg0, %c0_i32 : i32, i32
  }
  func.func @transform_4(%arg0: i32) -> (i32, i32) {
    %c0_i32 = arith.constant 0 : i32
    %c0_i32_0 = arith.constant 0 : i32
    %c0_i32_1 = arith.constant 0 : i32
    return %c0_i32, %c0_i32_0 : i32, i32
  }
  func.func @transform_5(%arg0: i32) -> (i32, i32) {
    %c0_i32 = arith.constant 0 : i32
    %c0_i32_0 = arith.constant 0 : i32
    %c0_i32_1 = arith.constant 0 : i32
    return %c0_i32, %c0_i32_0 : i32, i32
  }
  func.func @transform_6(%arg0: i32) -> (i32, i32) {
    %c0_i32 = arith.constant 0 : i32
    %c0_i32_0 = arith.constant 0 : i32
    %c0_i32_1 = arith.constant 0 : i32
    return %c0_i32, %c0_i32_0 : i32, i32
  }
  func.func @transform_7(%arg0: i32) -> (i32, i32) {
    %c0_i32 = arith.constant 0 : i32
    %c0_i32_0 = arith.constant 0 : i32
    %c0_i32_1 = arith.constant 0 : i32
    return %c0_i32, %c0_i32_0 : i32, i32
  }
  func.func @transform_8(%arg0: i32) -> (i32, i32) {
    %c0_i32 = arith.constant 0 : i32
    %c0_i32_0 = arith.constant 0 : i32
    %c0_i32_1 = arith.constant 0 : i32
    return %c0_i32, %c0_i32_0 : i32, i32
  }
  func.func @transform_9(%arg0: i32) -> (i32, i32) {
    %c0_i32 = arith.constant 0 : i32
    %c0_i32_0 = arith.constant 0 : i32
    %c0_i32_1 = arith.constant 0 : i32
    return %c0_i32, %c0_i32_0 : i32, i32
  }
  func.func @transform_10(%arg0: i32) -> (i32, i32) {
    %c0_i32 = arith.constant 0 : i32
    %c0_i32_0 = arith.constant 0 : i32
    return %arg0, %c0_i32 : i32, i32
  }
}

module attributes {stable_mosaic.version = 11 : i64} {
  func.func @kernel(%arg0: i32, %arg1: memref<16x128xbf16, #tpu.memory_space<vmem>>, %arg2: memref<16x128xbf16, #tpu.memory_space<vmem>>, %arg3: memref<16x128xbf16, #tpu.memory_space<vmem>>, %arg4: memref<384x128xbf16, #tpu.memory_space<vmem>>, %arg5: memref<1x128xf32, #tpu.memory_space<vmem>>, %arg6: memref<128x128xbf16, #tpu.memory_space<vmem>>, %arg7: memref<1x128xf32, #tpu.memory_space<vmem>>, %arg8: memref<128x128xbf16, #tpu.memory_space<vmem>>, %arg9: memref<1x128xf32, #tpu.memory_space<vmem>>, %arg10: memref<16x128xf32, #tpu.memory_space<vmem>>) attributes {dimension_semantics = [#tpu.dimension_semantics<parallel>], iteration_bounds = array<i64: 1>, scalar_prefetch = 0 : i64, scratch_operands = 0 : i64, tpu.core_type = #tpu.core_type<tc>, window_params = [{transform_indices = @transform_0, window_bounds = array<i64: 16, 128>}, {transform_indices = @transform_1, window_bounds = array<i64: 16, 128>}, {transform_indices = @transform_2, window_bounds = array<i64: 16, 128>}, {pipeline_mode = #tpu.pipeline_mode<synchronous>, transform_indices = @transform_3, window_bounds = array<i64: 384, 128>}, {pipeline_mode = #tpu.pipeline_mode<synchronous>, transform_indices = @transform_4, window_bounds = array<i64: 1, 128>}, {pipeline_mode = #tpu.pipeline_mode<synchronous>, transform_indices = @transform_5, window_bounds = array<i64: 128, 128>}, {pipeline_mode = #tpu.pipeline_mode<synchronous>, transform_indices = @transform_6, window_bounds = array<i64: 1, 128>}, {pipeline_mode = #tpu.pipeline_mode<synchronous>, transform_indices = @transform_7, window_bounds = array<i64: 128, 128>}, {pipeline_mode = #tpu.pipeline_mode<synchronous>, transform_indices = @transform_8, window_bounds = array<i64: 1, 128>}, {transform_indices = @transform_9, window_bounds = array<i64: 16, 128>}]} {
    %c0 = arith.constant 0 : index
    %c0_0 = arith.constant 0 : index
    %0 = vector.load %arg1[%c0, %c0_0] : memref<16x128xbf16, #tpu.memory_space<vmem>>, vector<16x128xbf16>
    %c0_1 = arith.constant 0 : index
    %c0_2 = arith.constant 0 : index
    %1 = vector.load %arg2[%c0_1, %c0_2] : memref<16x128xbf16, #tpu.memory_space<vmem>>, vector<16x128xbf16>
    %c0_3 = arith.constant 0 : index
    %c0_4 = arith.constant 0 : index
    %2 = vector.load %arg3[%c0_3, %c0_4] : memref<16x128xbf16, #tpu.memory_space<vmem>>, vector<16x128xbf16>
    %3 = tpu.concatenate %0, %1, %2 in 1 : vector<16x128xbf16>, vector<16x128xbf16>, vector<16x128xbf16> -> vector<16x384xbf16>
    %c0_5 = arith.constant 0 : index
    %c0_6 = arith.constant 0 : index
    %4 = vector.load %arg4[%c0_5, %c0_6] : memref<384x128xbf16, #tpu.memory_space<vmem>>, vector<384x128xbf16>
    %cst = arith.constant dense<0.000000e+00> : vector<16x128xf32>
    %5 = tpu.matmul %3, %4, %cst {dimension_numbers = #tpu.dot_dimension_numbers<[1], [0], [0], [1], [0, 0, 1, 1], [], []>} : vector<16x384xbf16>, vector<384x128xbf16>, vector<16x128xf32> -> vector<16x128xf32>
    %c0_7 = arith.constant 0 : index
    %c0_8 = arith.constant 0 : index
    %6 = vector.load %arg5[%c0_7, %c0_8] : memref<1x128xf32, #tpu.memory_space<vmem>>, vector<1x128xf32>
    %7 = vector.broadcast %6 : vector<1x128xf32> to vector<16x128xf32>
    %8 = arith.addf %5, %7 : vector<16x128xf32>
    %cst_9 = arith.constant 0.000000e+00 : f32
    %9 = vector.broadcast %cst_9 : f32 to vector<16x128xf32>
    %10 = arith.maximumf %8, %9 : vector<16x128xf32>
    %11 = math.absf %8 : vector<16x128xf32>
    %cst_10 = arith.constant 0.000000e+00 : f32
    %12 = vector.broadcast %cst_10 : f32 to vector<16x128xf32>
    %13 = arith.subf %12, %11 : vector<16x128xf32>
    %14 = math.exp %13 : vector<16x128xf32>
    %15 = math.log1p %14 : vector<16x128xf32>
    %16 = arith.addf %10, %15 : vector<16x128xf32>
    %cst_11 = arith.constant 0.693147182 : f32
    %17 = vector.broadcast %cst_11 : f32 to vector<16x128xf32>
    %18 = arith.subf %16, %17 : vector<16x128xf32>
    %19 = arith.truncf %18 : vector<16x128xf32> to vector<16x128xbf16>
    %c0_12 = arith.constant 0 : index
    %c0_13 = arith.constant 0 : index
    %20 = vector.load %arg6[%c0_12, %c0_13] : memref<128x128xbf16, #tpu.memory_space<vmem>>, vector<128x128xbf16>
    %cst_14 = arith.constant dense<0.000000e+00> : vector<16x128xf32>
    %21 = tpu.matmul %19, %20, %cst_14 {dimension_numbers = #tpu.dot_dimension_numbers<[1], [0], [0], [1], [0, 0, 1, 1], [], []>} : vector<16x128xbf16>, vector<128x128xbf16>, vector<16x128xf32> -> vector<16x128xf32>
    %c0_15 = arith.constant 0 : index
    %c0_16 = arith.constant 0 : index
    %22 = vector.load %arg7[%c0_15, %c0_16] : memref<1x128xf32, #tpu.memory_space<vmem>>, vector<1x128xf32>
    %23 = vector.broadcast %22 : vector<1x128xf32> to vector<16x128xf32>
    %24 = arith.addf %21, %23 : vector<16x128xf32>
    %cst_17 = arith.constant 0.000000e+00 : f32
    %25 = vector.broadcast %cst_17 : f32 to vector<16x128xf32>
    %26 = arith.maximumf %24, %25 : vector<16x128xf32>
    %27 = math.absf %24 : vector<16x128xf32>
    %cst_18 = arith.constant 0.000000e+00 : f32
    %28 = vector.broadcast %cst_18 : f32 to vector<16x128xf32>
    %29 = arith.subf %28, %27 : vector<16x128xf32>
    %30 = math.exp %29 : vector<16x128xf32>
    %31 = math.log1p %30 : vector<16x128xf32>
    %32 = arith.addf %26, %31 : vector<16x128xf32>
    %cst_19 = arith.constant 0.693147182 : f32
    %33 = vector.broadcast %cst_19 : f32 to vector<16x128xf32>
    %34 = arith.subf %32, %33 : vector<16x128xf32>
    %35 = arith.truncf %34 : vector<16x128xf32> to vector<16x128xbf16>
    %c0_20 = arith.constant 0 : index
    %c0_21 = arith.constant 0 : index
    %36 = vector.load %arg8[%c0_20, %c0_21] : memref<128x128xbf16, #tpu.memory_space<vmem>>, vector<128x128xbf16>
    %cst_22 = arith.constant dense<0.000000e+00> : vector<16x128xf32>
    %37 = tpu.matmul %35, %36, %cst_22 {dimension_numbers = #tpu.dot_dimension_numbers<[1], [0], [0], [1], [0, 0, 1, 1], [], []>} : vector<16x128xbf16>, vector<128x128xbf16>, vector<16x128xf32> -> vector<16x128xf32>
    %c0_23 = arith.constant 0 : index
    %c0_24 = arith.constant 0 : index
    %38 = vector.load %arg9[%c0_23, %c0_24] : memref<1x128xf32, #tpu.memory_space<vmem>>, vector<1x128xf32>
    %39 = vector.broadcast %38 : vector<1x128xf32> to vector<16x128xf32>
    %40 = arith.addf %37, %39 : vector<16x128xf32>
    %cst_25 = arith.constant 0.000000e+00 : f32
    %41 = vector.broadcast %cst_25 : f32 to vector<16x128xf32>
    %42 = arith.maximumf %40, %41 : vector<16x128xf32>
    %43 = math.absf %40 : vector<16x128xf32>
    %cst_26 = arith.constant 0.000000e+00 : f32
    %44 = vector.broadcast %cst_26 : f32 to vector<16x128xf32>
    %45 = arith.subf %44, %43 : vector<16x128xf32>
    %46 = math.exp %45 : vector<16x128xf32>
    %47 = math.log1p %46 : vector<16x128xf32>
    %48 = arith.addf %42, %47 : vector<16x128xf32>
    %cst_27 = arith.constant 0.693147182 : f32
    %49 = vector.broadcast %cst_27 : f32 to vector<16x128xf32>
    %50 = arith.subf %48, %49 : vector<16x128xf32>
    %c0_28 = arith.constant 0 : index
    %c0_29 = arith.constant 0 : index
    %51 = vector.load %arg10[%c0_28, %c0_29] : memref<16x128xf32, #tpu.memory_space<vmem>>, vector<16x128xf32>
    tpu.vector_store %arg10[%c0_28, %c0_29], %50 {strides = array<i32>} : memref<16x128xf32, #tpu.memory_space<vmem>>, vector<16x128xf32>,
    return
  }
  func.func @transform_0(%arg0: i32) -> (i32, i32) {
    %c0_i32 = arith.constant 0 : i32
    %c0_i32_0 = arith.constant 0 : i32
    return %arg0, %c0_i32 : i32, i32
  }
  func.func @transform_1(%arg0: i32) -> (i32, i32) {
    %c0_i32 = arith.constant 0 : i32
    %c0_i32_0 = arith.constant 0 : i32
    return %arg0, %c0_i32 : i32, i32
  }
  func.func @transform_2(%arg0: i32) -> (i32, i32) {
    %c0_i32 = arith.constant 0 : i32
    %c0_i32_0 = arith.constant 0 : i32
    return %arg0, %c0_i32 : i32, i32
  }
  func.func @transform_3(%arg0: i32) -> (i32, i32) {
    %c0_i32 = arith.constant 0 : i32
    %c0_i32_0 = arith.constant 0 : i32
    %c0_i32_1 = arith.constant 0 : i32
    return %c0_i32, %c0_i32_0 : i32, i32
  }
  func.func @transform_4(%arg0: i32) -> (i32, i32) {
    %c0_i32 = arith.constant 0 : i32
    %c0_i32_0 = arith.constant 0 : i32
    %c0_i32_1 = arith.constant 0 : i32
    return %c0_i32, %c0_i32_0 : i32, i32
  }
  func.func @transform_5(%arg0: i32) -> (i32, i32) {
    %c0_i32 = arith.constant 0 : i32
    %c0_i32_0 = arith.constant 0 : i32
    %c0_i32_1 = arith.constant 0 : i32
    return %c0_i32, %c0_i32_0 : i32, i32
  }
  func.func @transform_6(%arg0: i32) -> (i32, i32) {
    %c0_i32 = arith.constant 0 : i32
    %c0_i32_0 = arith.constant 0 : i32
    %c0_i32_1 = arith.constant 0 : i32
    return %c0_i32, %c0_i32_0 : i32, i32
  }
  func.func @transform_7(%arg0: i32) -> (i32, i32) {
    %c0_i32 = arith.constant 0 : i32
    %c0_i32_0 = arith.constant 0 : i32
    %c0_i32_1 = arith.constant 0 : i32
    return %c0_i32, %c0_i32_0 : i32, i32
  }
  func.func @transform_8(%arg0: i32) -> (i32, i32) {
    %c0_i32 = arith.constant 0 : i32
    %c0_i32_0 = arith.constant 0 : i32
    %c0_i32_1 = arith.constant 0 : i32
    return %c0_i32, %c0_i32_0 : i32, i32
  }
  func.func @transform_9(%arg0: i32) -> (i32, i32) {
    %c0_i32 = arith.constant 0 : i32
    %c0_i32_0 = arith.constant 0 : i32
    return %arg0, %c0_i32 : i32, i32
  }
}

module attributes {stable_mosaic.version = 11 : i64} {
  func.func @_segmean_kernel(%arg0: i32, %arg1: i32, %arg2: memref<1x128xi32, #tpu.memory_space<vmem>>, %arg3: memref<16x1xf32, #tpu.memory_space<vmem>>, %arg4: memref<128x128xbf16, #tpu.memory_space<vmem>>, %arg5: memref<16x128xbf16, #tpu.memory_space<vmem>>, %arg6: memref<16x128xf32, #tpu.memory_space<vmem>>) attributes {dimension_semantics = [#tpu.dimension_semantics<parallel>, #tpu.dimension_semantics<arbitrary>], iteration_bounds = array<i64: 1, 1>, scalar_prefetch = 0 : i64, scratch_operands = 1 : i64, tpu.core_type = #tpu.core_type<tc>, window_params = [{transform_indices = @transform_0, window_bounds = array<i64: 1, 128>}, {transform_indices = @transform_1, window_bounds = array<i64: 16, 1>}, {transform_indices = @transform_2, window_bounds = array<i64: 128, 128>}, {transform_indices = @transform_3, window_bounds = array<i64: 16, 128>}]} {
    %c0_i32 = arith.constant 0 : i32
    %0 = arith.cmpi eq, %arg1, %c0_i32 : i32
    %1 = arith.extui %0 : i1 to i32
    %c0_i32_0 = arith.constant 0 : i32
    %2 = arith.cmpi ne, %1, %c0_i32_0 : i32
    scf.if %2 {
      %cst_10 = arith.constant 0.000000e+00 : f32
      %21 = vector.broadcast %cst_10 : f32 to vector<16x128xf32>
      %c0_11 = arith.constant 0 : index
      %c0_12 = arith.constant 0 : index
      %22 = vector.load %arg6[%c0_11, %c0_12] : memref<16x128xf32, #tpu.memory_space<vmem>>, vector<16x128xf32>
      tpu.vector_store %arg6[%c0_11, %c0_12], %21 {strides = array<i32>} : memref<16x128xf32, #tpu.memory_space<vmem>>, vector<16x128xf32>,
    } else {
    }
    %c0 = arith.constant 0 : index
    %c0_1 = arith.constant 0 : index
    %3 = vector.load %arg2[%c0, %c0_1] : memref<1x128xi32, #tpu.memory_space<vmem>>, vector<1x128xi32>
    %c16_i32 = arith.constant 16 : i32
    %4 = arith.muli %arg0, %c16_i32 : i32
    %5 = vector.broadcast %4 : i32 to vector<1x128xi32>
    %6 = arith.subi %3, %5 : vector<1x128xi32>
    %7 = tpu.iota {dimensions = array<i32: 0>} : vector<16x128xi32>
    %8 = vector.broadcast %6 : vector<1x128xi32> to vector<16x128xi32>
    %9 = arith.cmpi eq, %7, %8 : vector<16x128xi32>
    %10 = arith.extui %9 : vector<16x128xi1> to vector<16x128xi32>
    %11 = arith.sitofp %10 : vector<16x128xi32> to vector<16x128xf32>
    %12 = arith.truncf %11 : vector<16x128xf32> to vector<16x128xbf16>
    %c0_2 = arith.constant 0 : index
    %c0_3 = arith.constant 0 : index
    %13 = vector.load %arg6[%c0_2, %c0_3] : memref<16x128xf32, #tpu.memory_space<vmem>>, vector<16x128xf32>
    %c0_4 = arith.constant 0 : index
    %c0_5 = arith.constant 0 : index
    %14 = vector.load %arg4[%c0_4, %c0_5] : memref<128x128xbf16, #tpu.memory_space<vmem>>, vector<128x128xbf16>
    %cst = arith.constant dense<0.000000e+00> : vector<16x128xf32>
    %15 = tpu.matmul %12, %14, %cst {dimension_numbers = #tpu.dot_dimension_numbers<[1], [0], [0], [1], [0, 0, 1, 1], [], []>} : vector<16x128xbf16>, vector<128x128xbf16>, vector<16x128xf32> -> vector<16x128xf32>
    %16 = arith.addf %13, %15 : vector<16x128xf32>
    %c0_6 = arith.constant 0 : index
    %c0_7 = arith.constant 0 : index
    %17 = vector.load %arg6[%c0_6, %c0_7] : memref<16x128xf32, #tpu.memory_space<vmem>>, vector<16x128xf32>
    tpu.vector_store %arg6[%c0_6, %c0_7], %16 {strides = array<i32>} : memref<16x128xf32, #tpu.memory_space<vmem>>, vector<16x128xf32>,
    %c0_i32_8 = arith.constant 0 : i32
    %18 = arith.cmpi eq, %arg1, %c0_i32_8 : i32
    %19 = arith.extui %18 : i1 to i32
    %c0_i32_9 = arith.constant 0 : i32
    %20 = arith.cmpi ne, %19, %c0_i32_9 : i32
    scf.if %20 {
      %c0_10 = arith.constant 0 : index
      %c0_11 = arith.constant 0 : index
      %21 = vector.load %arg6[%c0_10, %c0_11] : memref<16x128xf32, #tpu.memory_space<vmem>>, vector<16x128xf32>
      %c0_12 = arith.constant 0 : index
      %c0_13 = arith.constant 0 : index
      %22 = vector.load %arg3[%c0_12, %c0_13] : memref<16x1xf32, #tpu.memory_space<vmem>>, vector<16x1xf32>
      %23 = vector.broadcast %22 : vector<16x1xf32> to vector<16x128xf32>
      %24 = arith.mulf %21, %23 : vector<16x128xf32>
      %25 = arith.truncf %24 : vector<16x128xf32> to vector<16x128xbf16>
      %c0_14 = arith.constant 0 : index
      %c0_15 = arith.constant 0 : index
      %26 = vector.load %arg5[%c0_14, %c0_15] : memref<16x128xbf16, #tpu.memory_space<vmem>>, vector<16x128xbf16>
      tpu.vector_store %arg5[%c0_14, %c0_15], %25 {strides = array<i32>} : memref<16x128xbf16, #tpu.memory_space<vmem>>, vector<16x128xbf16>,
    } else {
    }
    return
  }
  func.func @transform_0(%arg0: i32, %arg1: i32) -> (i32, i32) {
    %c0_i32 = arith.constant 0 : i32
    %c0_i32_0 = arith.constant 0 : i32
    return %c0_i32, %arg1 : i32, i32
  }
  func.func @transform_1(%arg0: i32, %arg1: i32) -> (i32, i32) {
    %c0_i32 = arith.constant 0 : i32
    %c0_i32_0 = arith.constant 0 : i32
    return %arg0, %c0_i32 : i32, i32
  }
  func.func @transform_2(%arg0: i32, %arg1: i32) -> (i32, i32) {
    %c0_i32 = arith.constant 0 : i32
    %c0_i32_0 = arith.constant 0 : i32
    return %arg1, %c0_i32 : i32, i32
  }
  func.func @transform_3(%arg0: i32, %arg1: i32) -> (i32, i32) {
    %c0_i32 = arith.constant 0 : i32
    %c0_i32_0 = arith.constant 0 : i32
    return %arg0, %c0_i32 : i32, i32
  }
}

</mosaic_0001>

<bundles_post_ra>
// kernel: megnet_layer_forward.5
= control target key start
LH: loop header
LB: loop body
LE: loop exit
PB: predicated region body
PF: predicated region fallthrough
CT: control target
= control target key end

     0   :  { %v457_v0 = vmov 0.0   ;;  %vm458_vm0 = vmmov 0   ;;  %s549_s1 = inlined_call_operand.vmem [shape: bf16[128,128], index: 1, kind: input, shape index: {}]   ;;  %s550_s0 = inlined_call_operand.vmem [shape: bf16[16,128], index: 0, kind: input, shape index: {}]   ;;  %s551_s3 = inlined_call_operand.vmem [shape: bf16[128,128], index: 3, kind: input, shape index: {}]   ;;  %s552_s2 = inlined_call_operand.vmem [shape: f32[1,128], index: 2, kind: input, shape index: {}]   ;;  %s553_s4 = inlined_call_operand.vmem [shape: f32[1,128], index: 4, kind: input, shape index: {}]   ;;  %s554_s5 = inlined_call_operand.vmem [shape: bf16[16,128], index: 5, kind: output, shape index: {}]  }
   0x1   :  { %382 = vmatprep.subr.bf16.mxu0 %v457_v0  ;;  %v424_v1 = vld [vmem:[%s549_s1] sm:$0xff]   ;;  %398 = vmatprep.mubr.msk.bf16.mxu0 %vm458_vm0, %v457_v0  ;;  %v425_v2 = vld [vmem:[%s549_s1 + $0x8] sm:$0xff]   ;;  %v426_v3 = vld [vmem:[%s549_s1 + $0x10] sm:$0xff]  }
   0x2   :  { %402 = vmatprep.subr.bf16.mxu1 %v457_v0  ;;  %418 = vmatprep.mubr.msk.bf16.mxu1 %vm458_vm0, %v457_v0  ;;  %v427_v4 = vld [vmem:[%s549_s1 + $0x18] sm:$0xff]   ;;  %v428_v5 = vld [vmem:[%s549_s1 + $0x20] sm:$0xff]   ;;  %v429_v6 = vld [vmem:[%s549_s1 + $0x28] sm:$0xff]  }
   0x3   :  { %383 = vmatpush3.bf16.msra.mxu0 %v424_v1  ;;  %v430_v7 = vld [vmem:[%s549_s1 + $0x30] sm:$0xff]   ;;  %v431_v8 = vld [vmem:[%s549_s1 + $0x38] sm:$0xff]   ;;  %v432_v9 = vld [vmem:[%s550_s0] sm:$0xff]  }
   0x4   :  { %384 = vmatprep.subr.bf16.mxu0 %v457_v0  ;;  %v433_v10 = vld [vmem:[%s551_s3] sm:$0xff]   ;;  %v434_v11 = vld [vmem:[%s551_s3 + $0x8] sm:$0xff]   ;;  %v435_v12 = vld [vmem:[%s551_s3 + $0x10] sm:$0xff]  }
   0x5   :  { %403 = vmatpush3.bf16.msra.mxu1 %v433_v10  ;;  %v436_v13 = vld [vmem:[%s551_s3 + $0x18] sm:$0xff]   ;;  %v437_v14 = vld [vmem:[%s551_s3 + $0x20] sm:$0xff]   ;;  %v438_v15 = vld [vmem:[%s551_s3 + $0x28] sm:$0xff]  }
   0x6   :  { %404 = vmatprep.subr.bf16.mxu1 %v457_v0  ;;  %v439_v16 = vld [vmem:[%s551_s3 + $0x30] sm:$0xff]   ;;  %v440_v17 = vld [vmem:[%s551_s3 + $0x38] sm:$0xff]   ;;  %v332_v18 = vld [vmem:[%s552_s2] ss:$0 sm:$0xff] }
   0x7   :  { %385 = vmatpush3.bf16.msra.mxu0 %v425_v2  ;;  %v344_v56 = vld [vmem:[%s553_s4] ss:$0 sm:$0xff] }
   0x8   :  { %386 = vmatprep.subr.bf16.mxu0 %v457_v0 }
   0x9   :  { %405 = vmatpush3.bf16.msra.mxu1 %v434_v11 }
   0xa   :  { %406 = vmatprep.subr.bf16.mxu1 %v457_v0 }
   0xb   :  { %387 = vmatpush3.bf16.msra.mxu0 %v426_v3 }
   0xc   :  { %388 = vmatprep.subr.bf16.mxu0 %v457_v0 }
   0xd   :  { %407 = vmatpush3.bf16.msra.mxu1 %v435_v12 }
   0xe   :  { %408 = vmatprep.subr.bf16.mxu1 %v457_v0 }
   0xf   :  { %389 = vmatpush3.bf16.msra.mxu0 %v427_v4 }
  0x10   :  { %390 = vmatprep.subr.bf16.mxu0 %v457_v0 }
  0x11   :  { %409 = vmatpush3.bf16.msra.mxu1 %v436_v13 }
  0x12   :  { %410 = vmatprep.subr.bf16.mxu1 %v457_v0 }
  0x13   :  { %391 = vmatpush3.bf16.msra.mxu0 %v428_v5 }
  0x14   :  { %392 = vmatprep.subr.bf16.mxu0 %v457_v0 }
  0x15   :  { %411 = vmatpush3.bf16.msra.mxu1 %v437_v14 }
  0x16   :  { %412 = vmatprep.subr.bf16.mxu1 %v457_v0 }
  0x17   :  { %393 = vmatpush3.bf16.msra.mxu0 %v429_v6 }
  0x18   :  { %394 = vmatprep.subr.bf16.mxu0 %v457_v0 }
  0x19   :  { %413 = vmatpush3.bf16.msra.mxu1 %v438_v15 }
  0x1a   :  { %414 = vmatprep.subr.bf16.mxu1 %v457_v0 }
  0x1b   :  { %395 = vmatpush3.bf16.msra.mxu0 %v430_v7 }
  0x1c   :  { %396 = vmatprep.subr.bf16.mxu0 %v457_v0 }
  0x1d   :  { %415 = vmatpush3.bf16.msra.mxu1 %v439_v16 }
  0x1e   :  { %416 = vmatprep.subr.bf16.mxu1 %v457_v0 }
  0x1f   :  { %397 = vmatpush3.bf16.msra.mxu0 %v431_v8 }
  0x21   :  { %417 = vmatpush3.bf16.msra.mxu1 %v440_v17 }
  0x22   :  { %399 = vmatmul.mubr.bf16.vlgmr.msra.gmra.mrb[0].mxu0 %v432_v9 }
  0xf5   :  { %v134_v19 = vpop.f32.mrb[0].mxu0 }
  0xf6   :  { %v135_v20 = vadd.f32 %v332_v18, %v134_v19  ;;  %v400_v21 = vpop.f32.mrb[1].mxu0 }
  0xf7   :  { %v137_v22 = vpop.f32.mrb[2].mxu0 }
  0xf8   :  { %v143_v23 = vand.u32 2147483647, %v135_v20  ;;  %v138_v24 = vadd.f32 %v332_v18, %v137_v22  ;;  %v401_v25 = vpop.f32.mrb[3].mxu0  ;;  %v141_v45 = vmax.f32 %v135_v20, 0.0 }
  0xfa   :  { %v145_v26 = vsub.f32 0.0, %v143_v23  ;;  %v144_v27 = vand.u32 2147483647, %v138_v24  ;;  %v142_v50 = vmax.f32 %v138_v24, 0.0 }
  0xfc   :  { %v147_v28 = vmul.f32 1.442695, %v145_v26  ;;  %v146_v29 = vsub.f32 0.0, %v144_v27 }
  0xfe   :  { %441 = vpow2.f32 %v147_v28  ;;  %v149_v30 = vmul.f32 1.442695, %v146_v29 }
 0x100   :  { %443 = vpow2.f32 %v149_v30 }
 0x108   :  { %v442_v31 = vpop.eup %441 }
 0x109   :  { %v151_v32 = vadd.f32 1.0, %v442_v31  ;;  %v154_v35 = vmul.f32 -0.5, %v442_v31  ;;  %v157_v38 = vand.u32 2147483647, %v442_v31 }
 0x10a   :  { %v444_v33 = vpop.eup %443 }
 0x10b   :  { %445 = vlog2.f32 %v151_v32  ;;  %v160_v34 = vadd.f32 1.0, %v444_v33  ;;  %v163_v36 = vmul.f32 -0.5, %v444_v33  ;;  %v155_v37 = vadd.f32 1.0, %v154_v35 }
 0x10c   :  { %v166_v41 = vand.u32 2147483647, %v444_v33  ;;  %vm158_vm1 = vcmp.lt.f32.partialorder %v157_v38, 0.0004427343 }
 0x10d   :  { %447 = vlog2.f32 %v160_v34  ;;  %v164_v39 = vadd.f32 1.0, %v163_v36  ;;  %v156_v43 = vmul.f32 %v442_v31, %v155_v37 }
 0x10e   :  { %vm167_vm2 = vcmp.lt.f32.partialorder %v166_v41, 0.0004427343 }
 0x10f   :  { %v165_v48 = vmul.f32 %v444_v33, %v164_v39 }
 0x115   :  { %v446_v40 = vpop.eup %445 }
 0x116   :  { %v153_v42 = vmul.f32 0.6931472, %v446_v40 }
 0x117   :  { %v448_v44 = vpop.eup %447 }
 0x118   :  { %v159_v46 = vsel %vm158_vm1, %v156_v43, %v153_v42  ;;  %v162_v47 = vmul.f32 0.6931472, %v448_v44 }
 0x119   :  { %v169_v49 = vadd.f32 %v159_v46, %v141_v45 }
 0x11a   :  { %v168_v51 = vsel %vm167_vm2, %v165_v48, %v162_v47 }
 0x11b   :  { %v170_v52 = vadd.f32 %v168_v51, %v142_v50  ;;  %v342_v53 = vadd.f32 -0.6931472, %v169_v49 }
 0x11d   :  { %v343_v54 = vadd.f32 -0.6931472, %v170_v52 }
 0x11f   :  { %v173_v55 = vpack.c.bf16 %v343_v54, %v342_v53 }
 0x121   :  { %419 = vmatmul.mubr.bf16.vlgmr.msra.gmra.mrb[0].mxu1 %v173_v55 }
 0x1f4   :  { %v279_v57 = vpop.f32.mrb[0].mxu1 }
 0x1f5   :  { %v280_v58 = vadd.f32 %v344_v56, %v279_v57  ;;  %v420_v59 = vpop.f32.mrb[1].mxu1 }
 0x1f6   :  { %v282_v60 = vpop.f32.mrb[2].mxu1 }
 0x1f7   :  { %v288_v61 = vand.u32 2147483647, %v280_v58  ;;  %v283_v62 = vadd.f32 %v344_v56, %v282_v60  ;;  %v421_v63 = vpop.f32.mrb[3].mxu1  ;;  %v286_v19 = vmax.f32 %v280_v58, 0.0 }
 0x1f9   :  { %v290_v0 = vsub.f32 0.0, %v288_v61  ;;  %v289_v1 = vand.u32 2147483647, %v283_v62  ;;  %v287_v24 = vmax.f32 %v283_v62, 0.0 }
 0x1fb   :  { %v292_v2 = vmul.f32 1.442695, %v290_v0  ;;  %v291_v3 = vsub.f32 0.0, %v289_v1 }
 0x1fd   :  { %449 = vpow2.f32 %v292_v2  ;;  %v294_v4 = vmul.f32 1.442695, %v291_v3 }
 0x1ff   :  { %451 = vpow2.f32 %v294_v4 }
 0x207   :  { %v450_v5 = vpop.eup %449 }
 0x208   :  { %v296_v6 = vadd.f32 1.0, %v450_v5  ;;  %v299_v9 = vmul.f32 -0.5, %v450_v5  ;;  %v302_v12 = vand.u32 2147483647, %v450_v5 }
 0x209   :  { %v452_v7 = vpop.eup %451 }
 0x20a   :  { %453 = vlog2.f32 %v296_v6  ;;  %v305_v8 = vadd.f32 1.0, %v452_v7  ;;  %v308_v10 = vmul.f32 -0.5, %v452_v7  ;;  %v300_v11 = vadd.f32 1.0, %v299_v9 }
 0x20b   :  { %v311_v15 = vand.u32 2147483647, %v452_v7  ;;  %vm303_vm3 = vcmp.lt.f32.partialorder %v302_v12, 0.0004427343 }
 0x20c   :  { %455 = vlog2.f32 %v305_v8  ;;  %v309_v13 = vadd.f32 1.0, %v308_v10  ;;  %v301_v17 = vmul.f32 %v450_v5, %v300_v11 }
 0x20d   :  { %vm312_vm4 = vcmp.lt.f32.partialorder %v311_v15, 0.0004427343 }
 0x20e   :  { %v310_v22 = vmul.f32 %v452_v7, %v309_v13 }
 0x214   :  { %v454_v14 = vpop.eup %453 }
 0x215   :  { %v298_v16 = vmul.f32 0.6931472, %v454_v14 }
 0x216   :  { %v456_v18 = vpop.eup %455 }
 0x217   :  { %v304_v20 = vsel %vm303_vm3, %v301_v17, %v298_v16  ;;  %v307_v21 = vmul.f32 0.6931472, %v456_v18 }
 0x218   :  { %v314_v23 = vadd.f32 %v304_v20, %v286_v19 }
 0x219   :  { %v313_v25 = vsel %vm312_vm4, %v310_v22, %v307_v21 }
 0x21a   :  { %v315_v26 = vadd.f32 %v313_v25, %v287_v24  ;;  %v353_v27 = vadd.f32 -0.6931472, %v314_v23 }
 0x21c   :  { %v354_v28 = vadd.f32 -0.6931472, %v315_v26 }
 0x21e   :  { %v362_v29 = vpack.c.bf16 %v354_v28, %v353_v27 }
 0x220   :  { %363 = vst [vmem:[%s554_s5] sm:$0xff] %v362_v29  }

// kernel: megnet_layer_forward.7
= control target key start
LH: loop header
LB: loop body
LE: loop exit
PB: predicated region body
PF: predicated region fallthrough
CT: control target
= control target key end

     0   :  { %v982_v37 = vmov 0.0   ;;  %vm983_vm0 = vmmov 0   ;;  %s1228_s4 = inlined_call_operand.vmem [shape: bf16[512,128], index: 4, kind: input, shape index: {}]   ;;  %s1229_s1 = inlined_call_operand.vmem [shape: bf16[16,128], index: 1, kind: input, shape index: {}]   ;;  %s1230_s3 = inlined_call_operand.vmem [shape: bf16[16,128], index: 3, kind: input, shape index: {}]   ;;  %s1231_s0 = inlined_call_operand.vmem [shape: bf16[16,128], index: 0, kind: input, shape index: {}]   ;;  %s1232_s2 = inlined_call_operand.vmem [shape: bf16[16,128], index: 2, kind: input, shape index: {}]   ;;  %s1233_s6 = inlined_call_operand.vmem [shape: bf16[128,128], index: 6, kind: input, shape index: {}]   ;;  %s1234_s5 = inlined_call_operand.vmem [shape: f32[1,128], index: 5, kind: input, shape index: {}]   ;;  %s1235_s8 = inlined_call_operand.vmem [shape: bf16[128,128], index: 8, kind: input, shape index: {}]   ;;  %s1236_s7 = inlined_call_operand.vmem [shape: f32[1,128], index: 7, kind: input, shape index: {}]   ;;  %s1237_s9 = inlined_call_operand.vmem [shape: f32[1,128], index: 9, kind: input, shape index: {}]   ;;  %s1238_s10 = inlined_call_operand.vmem [shape: f32[16,128], index: 10, kind: output, shape index: {}]  }
   0x1   :  { %v906_v0 = vld [vmem:[%s1228_s4 + $0x40] sm:$0xff]   ;;  %v910_v4 = vld [vmem:[%s1228_s4 + $0x48] sm:$0xff]   ;;  %v914_v8 = vld [vmem:[%s1228_s4 + $0x50] sm:$0xff]  }
   0x2   :  { %v907_v1 = vld [vmem:[%s1228_s4 + $0xc0] sm:$0xff]   ;;  %802 = vmatprep.subr.bf16.mxu0 %v906_v0  ;;  %v911_v5 = vld [vmem:[%s1228_s4 + $0xc8] sm:$0xff]   ;;  %v915_v9 = vld [vmem:[%s1228_s4 + $0xd0] sm:$0xff]  }
   0x3   :  { %v908_v2 = vld [vmem:[%s1228_s4] sm:$0xff]   ;;  %824 = vmatprep.subr.bf16.mxu1 %v907_v1  ;;  %v912_v6 = vld [vmem:[%s1228_s4 + $0x8] sm:$0xff]   ;;  %v916_v10 = vld [vmem:[%s1228_s4 + $0x10] sm:$0xff]  }
   0x4   :  { %v909_v3 = vld [vmem:[%s1228_s4 + $0x80] sm:$0xff]   ;;  %803 = vmatpush3.bf16.msra.mxu0 %v908_v2  ;;  %v913_v7 = vld [vmem:[%s1228_s4 + $0x88] sm:$0xff]   ;;  %v917_v11 = vld [vmem:[%s1228_s4 + $0x90] sm:$0xff]  }
   0x5   :  { %825 = vmatpush3.bf16.msra.mxu1 %v909_v3  ;;  %804 = vmatprep.subr.bf16.mxu0 %v910_v4  ;;  %v918_v12 = vld [vmem:[%s1228_s4 + $0x58] sm:$0xff]   ;;  %v922_v16 = vld [vmem:[%s1228_s4 + $0x60] sm:$0xff]   ;;  %v926_v20 = vld [vmem:[%s1228_s4 + $0x68] sm:$0xff]  }
   0x6   :  { %826 = vmatprep.subr.bf16.mxu1 %v911_v5  ;;  %v919_v13 = vld [vmem:[%s1228_s4 + $0xd8] sm:$0xff]   ;;  %v923_v17 = vld [vmem:[%s1228_s4 + $0xe0] sm:$0xff]   ;;  %v927_v21 = vld [vmem:[%s1228_s4 + $0xe8] sm:$0xff]  }
   0x7   :  { %v920_v14 = vld [vmem:[%s1228_s4 + $0x18] sm:$0xff]   ;;  %v924_v18 = vld [vmem:[%s1228_s4 + $0x20] sm:$0xff]   ;;  %v928_v22 = vld [vmem:[%s1228_s4 + $0x28] sm:$0xff]  }
   0x8   :  { %805 = vmatpush3.bf16.msra.mxu0 %v912_v6  ;;  %v921_v15 = vld [vmem:[%s1228_s4 + $0x98] sm:$0xff]   ;;  %v925_v19 = vld [vmem:[%s1228_s4 + $0xa0] sm:$0xff]   ;;  %v929_v23 = vld [vmem:[%s1228_s4 + $0xa8] sm:$0xff]  }
   0x9   :  { %827 = vmatpush3.bf16.msra.mxu1 %v913_v7  ;;  %806 = vmatprep.subr.bf16.mxu0 %v914_v8  ;;  %v930_v24 = vld [vmem:[%s1228_s4 + $0x70] sm:$0xff]   ;;  %v934_v28 = vld [vmem:[%s1228_s4 + $0x78] sm:$0xff]   ;;  %v938_v32 = vld [vmem:[%s1229_s1] sm:$0xff]  }
   0xa   :  { %828 = vmatprep.subr.bf16.mxu1 %v915_v9  ;;  %v931_v25 = vld [vmem:[%s1228_s4 + $0xf0] sm:$0xff]   ;;  %v935_v29 = vld [vmem:[%s1228_s4 + $0xf8] sm:$0xff]   ;;  %v939_v33 = vld [vmem:[%s1230_s3] sm:$0xff]   ;;  %363 = vmatprep.mubr.bf16.mxu0 %v938_v32 }
   0xb   :  { %v932_v26 = vld [vmem:[%s1228_s4 + $0x30] sm:$0xff]   ;;  %v936_v30 = vld [vmem:[%s1228_s4 + $0x38] sm:$0xff]   ;;  %v940_v34 = vld [vmem:[%s1231_s0] sm:$0xff]   ;;  %404 = vmatprep.mubr.bf16.mxu1 %v939_v33 }
   0xc   :  { %807 = vmatpush3.bf16.msra.mxu0 %v916_v10  ;;  %v933_v27 = vld [vmem:[%s1228_s4 + $0xb0] sm:$0xff]   ;;  %v937_v31 = vld [vmem:[%s1228_s4 + $0xb8] sm:$0xff]   ;;  %v941_v35 = vld [vmem:[%s1232_s2] sm:$0xff]  }
   0xd   :  { %829 = vmatpush3.bf16.msra.mxu1 %v917_v11  ;;  %808 = vmatprep.subr.bf16.mxu0 %v918_v12  ;;  %v942_v36 = vld [vmem:[%s1233_s6] sm:$0xff]   ;;  %v943_v38 = vld [vmem:[%s1233_s6 + $0x8] sm:$0xff]   ;;  %v944_v39 = vld [vmem:[%s1233_s6 + $0x10] sm:$0xff]  }
   0xe   :  { %830 = vmatprep.subr.bf16.mxu1 %v919_v13  ;;  %v945_v40 = vld [vmem:[%s1233_s6 + $0x18] sm:$0xff]   ;;  %v946_v41 = vld [vmem:[%s1233_s6 + $0x20] sm:$0xff]   ;;  %v947_v42 = vld [vmem:[%s1233_s6 + $0x28] sm:$0xff]  }
   0xf   :  { %v948_v43 = vld [vmem:[%s1233_s6 + $0x30] sm:$0xff]   ;;  %v949_v44 = vld [vmem:[%s1233_s6 + $0x38] sm:$0xff]   ;;  %v745_v47 = vld [vmem:[%s1234_s5] ss:$0 sm:$0xff] }
  0x10   :  { %809 = vmatpush3.bf16.msra.mxu0 %v920_v14  ;;  %v953_v32 = vld [vmem:[%s1235_s8 + $0x18] sm:$0xff]   ;;  %v954_v33 = vld [vmem:[%s1235_s8 + $0x20] sm:$0xff]  }
  0x11   :  { %831 = vmatpush3.bf16.msra.mxu1 %v921_v15  ;;  %810 = vmatprep.subr.bf16.mxu0 %v922_v16 }
  0x12   :  { %832 = vmatprep.subr.bf16.mxu1 %v923_v17 }
  0x14   :  { %811 = vmatpush3.bf16.msra.mxu0 %v924_v18 }
  0x15   :  { %833 = vmatpush3.bf16.msra.mxu1 %v925_v19  ;;  %812 = vmatprep.subr.bf16.mxu0 %v926_v20 }
  0x16   :  { %834 = vmatprep.subr.bf16.mxu1 %v927_v21 }
  0x18   :  { %813 = vmatpush3.bf16.msra.mxu0 %v928_v22 }
  0x19   :  { %835 = vmatpush3.bf16.msra.mxu1 %v929_v23  ;;  %814 = vmatprep.subr.bf16.mxu0 %v930_v24 }
  0x1a   :  { %836 = vmatprep.subr.bf16.mxu1 %v931_v25 }
  0x1c   :  { %815 = vmatpush3.bf16.msra.mxu0 %v932_v26 }
  0x1d   :  { %837 = vmatpush3.bf16.msra.mxu1 %v933_v27  ;;  %816 = vmatprep.subr.bf16.mxu0 %v934_v28 }
  0x1e   :  { %838 = vmatprep.subr.bf16.mxu1 %v935_v29  ;;  %v950_v29 = vld [vmem:[%s1235_s8] sm:$0xff]  }
  0x20   :  { %817 = vmatpush3.bf16.msra.mxu0 %v936_v30  ;;  %v951_v30 = vld [vmem:[%s1235_s8 + $0x8] sm:$0xff]  }
  0x21   :  { %839 = vmatpush3.bf16.msra.mxu1 %v937_v31  ;;  %864 = vmatprep.subr.bf16.mxu0 %v982_v37  ;;  %v952_v31 = vld [vmem:[%s1235_s8 + $0x10] sm:$0xff]  }
  0x22   :  { %884 = vmatprep.subr.bf16.mxu1 %v982_v37 }
  0x23   :  { %364 = vmatmul.mubr.bf16.vlgmr.msra.gmra.mrb[0].mxu0 %v940_v34  ;;  %v955_v34 = vld [vmem:[%s1235_s8 + $0x28] sm:$0xff]  }
  0x24   :  { %405 = vmatmul.mubr.bf16.vlgmr.msra.gmra.mrb[0].mxu1 %v941_v35  ;;  %865 = vmatpush3.bf16.msra.mxu0 %v942_v36  ;;  %v956_v35 = vld [vmem:[%s1235_s8 + $0x30] sm:$0xff]   ;;  %v957_v36 = vld [vmem:[%s1235_s8 + $0x38] sm:$0xff]  }
  0x25   :  { %866 = vmatprep.subr.bf16.mxu0 %v982_v37  ;;  %880 = vmatprep.mubr.msk.bf16.mxu0 %vm983_vm0, %v982_v37 }
  0x26   :  { %900 = vmatprep.mubr.msk.bf16.mxu1 %vm983_vm0, %v982_v37  ;;  %885 = vmatpush3.bf16.msra.mxu1 %v950_v29 }
  0x27   :  { %886 = vmatprep.subr.bf16.mxu1 %v982_v37 }
  0x28   :  { %867 = vmatpush3.bf16.msra.mxu0 %v943_v38  ;;  %v780_v38 = vld [vmem:[%s1236_s7] ss:$0 sm:$0xff] }
  0x29   :  { %868 = vmatprep.subr.bf16.mxu0 %v982_v37 }
  0x2a   :  { %887 = vmatpush3.bf16.msra.mxu1 %v951_v30 }
  0x2b   :  { %888 = vmatprep.subr.bf16.mxu1 %v982_v37 }
  0x2c   :  { %869 = vmatpush3.bf16.msra.mxu0 %v944_v39 }
  0x2d   :  { %870 = vmatprep.subr.bf16.mxu0 %v982_v37 }
  0x2e   :  { %889 = vmatpush3.bf16.msra.mxu1 %v952_v31 }
  0x2f   :  { %890 = vmatprep.subr.bf16.mxu1 %v982_v37 }
  0x30   :  { %871 = vmatpush3.bf16.msra.mxu0 %v945_v40 }
  0x31   :  { %872 = vmatprep.subr.bf16.mxu0 %v982_v37 }
  0x32   :  { %891 = vmatpush3.bf16.msra.mxu1 %v953_v32 }
  0x33   :  { %892 = vmatprep.subr.bf16.mxu1 %v982_v37 }
  0x34   :  { %873 = vmatpush3.bf16.msra.mxu0 %v946_v41 }
  0x35   :  { %874 = vmatprep.subr.bf16.mxu0 %v982_v37 }
  0x36   :  { %893 = vmatpush3.bf16.msra.mxu1 %v954_v33 }
  0x37   :  { %894 = vmatprep.subr.bf16.mxu1 %v982_v37 }
  0x38   :  { %875 = vmatpush3.bf16.msra.mxu0 %v947_v42 }
  0x39   :  { %876 = vmatprep.subr.bf16.mxu0 %v982_v37 }
  0x3a   :  { %895 = vmatpush3.bf16.msra.mxu1 %v955_v34 }
  0x3b   :  { %896 = vmatprep.subr.bf16.mxu1 %v982_v37 }
  0x3c   :  { %877 = vmatpush3.bf16.msra.mxu0 %v948_v43 }
  0x3d   :  { %878 = vmatprep.subr.bf16.mxu0 %v982_v37 }
  0x3e   :  { %897 = vmatpush3.bf16.msra.mxu1 %v956_v35 }
  0x3f   :  { %898 = vmatprep.subr.bf16.mxu1 %v982_v37 }
  0x40   :  { %879 = vmatpush3.bf16.msra.mxu0 %v949_v44 }
  0x42   :  { %899 = vmatpush3.bf16.msra.mxu1 %v957_v36 }
  0xf6   :  { %v818_v45 = vpop.f32.mrb[0].mxu0 }
  0xf7   :  { %v840_v46 = vpop.f32.mrb[0].mxu1  ;;  %v819_v48 = vpop.f32.mrb[1].mxu0 }
  0xf8   :  { %v820_v49 = vadd.f32 %v819_v48, %v818_v45  ;;  %v841_v50 = vpop.f32.mrb[1].mxu1  ;;  %v821_v51 = vpop.f32.mrb[2].mxu0 }
  0xf9   :  { %v842_v52 = vadd.f32 %v841_v50, %v840_v46  ;;  %v843_v53 = vpop.f32.mrb[2].mxu1  ;;  %v822_v54 = vpop.f32.mrb[3].mxu0 }
  0xfa   :  { %v366_v55 = vadd.f32 %v820_v49, %v745_v47  ;;  %v823_v56 = vadd.f32 %v822_v54, %v821_v51  ;;  %v844_v57 = vpop.f32.mrb[3].mxu1 }
  0xfb   :  { %v845_v58 = vadd.f32 %v844_v57, %v843_v53 }
  0xfc   :  { %v407_v59 = vadd.f32 %v842_v52, %v366_v55  ;;  %v369_v60 = vadd.f32 %v823_v56, %v745_v47 }
  0xfe   :  { %v415_v61 = vand.u32 2147483647, %v407_v59  ;;  %v410_v62 = vadd.f32 %v845_v58, %v369_v60  ;;  %v413_v18 = vmax.f32 %v407_v59, 0.0 }
 0x100   :  { %v417_v63 = vsub.f32 0.0, %v415_v61  ;;  %v416_v0 = vand.u32 2147483647, %v410_v62  ;;  %v414_v23 = vmax.f32 %v410_v62, 0.0 }
 0x102   :  { %v419_v1 = vmul.f32 1.442695, %v417_v63  ;;  %v418_v2 = vsub.f32 0.0, %v416_v0 }
 0x104   :  { %958 = vpow2.f32 %v419_v1  ;;  %v421_v3 = vmul.f32 1.442695, %v418_v2 }
 0x106   :  { %960 = vpow2.f32 %v421_v3 }
 0x10e   :  { %v959_v4 = vpop.eup %958 }
 0x10f   :  { %v423_v5 = vadd.f32 1.0, %v959_v4  ;;  %v426_v8 = vmul.f32 -0.5, %v959_v4  ;;  %v429_v11 = vand.u32 2147483647, %v959_v4 }
 0x110   :  { %v961_v6 = vpop.eup %960 }
 0x111   :  { %962 = vlog2.f32 %v423_v5  ;;  %v432_v7 = vadd.f32 1.0, %v961_v6  ;;  %v435_v9 = vmul.f32 -0.5, %v961_v6  ;;  %v427_v10 = vadd.f32 1.0, %v426_v8 }
 0x112   :  { %v438_v14 = vand.u32 2147483647, %v961_v6  ;;  %vm430_vm1 = vcmp.lt.f32.partialorder %v429_v11, 0.0004427343  ;;  %v791_v11 = vld [vmem:[%s1237_s9] ss:$0 sm:$0xff] }
 0x113   :  { %964 = vlog2.f32 %v432_v7  ;;  %v436_v12 = vadd.f32 1.0, %v435_v9  ;;  %v428_v16 = vmul.f32 %v959_v4, %v427_v10 }
 0x114   :  { %vm439_vm2 = vcmp.lt.f32.partialorder %v438_v14, 0.0004427343 }
 0x115   :  { %v437_v21 = vmul.f32 %v961_v6, %v436_v12 }
 0x11b   :  { %v963_v13 = vpop.eup %962 }
 0x11c   :  { %v425_v15 = vmul.f32 0.6931472, %v963_v13 }
 0x11d   :  { %v965_v17 = vpop.eup %964 }
 0x11e   :  { %v431_v19 = vsel %vm430_vm1, %v428_v16, %v425_v15  ;;  %v434_v20 = vmul.f32 0.6931472, %v965_v17 }
 0x11f   :  { %v441_v22 = vadd.f32 %v431_v19, %v413_v18 }
 0x120   :  { %v440_v24 = vsel %vm439_vm2, %v437_v21, %v434_v20 }
 0x121   :  { %v442_v25 = vadd.f32 %v440_v24, %v414_v23  ;;  %v778_v26 = vadd.f32 -0.6931472, %v441_v22 }
 0x123   :  { %v779_v27 = vadd.f32 -0.6931472, %v442_v25 }
 0x125   :  { %v445_v28 = vpack.c.bf16 %v779_v27, %v778_v26 }
 0x127   :  { %881 = vmatmul.mubr.bf16.vlgmr.msra.gmra.mrb[4].mxu0 %v445_v28 }
 0x1fa   :  { %v551_v39 = vpop.f32.mrb[4].mxu0 }
 0x1fb   :  { %v552_v40 = vadd.f32 %v780_v38, %v551_v39  ;;  %v882_v41 = vpop.f32.mrb[5].mxu0 }
 0x1fc   :  { %v554_v42 = vpop.f32.mrb[6].mxu0 }
 0x1fd   :  { %v560_v43 = vand.u32 2147483647, %v552_v40  ;;  %v555_v44 = vadd.f32 %v780_v38, %v554_v42  ;;  %v883_v45 = vpop.f32.mrb[7].mxu0  ;;  %v558_v0 = vmax.f32 %v552_v40, 0.0 }
 0x1ff   :  { %v562_v46 = vsub.f32 0.0, %v560_v43  ;;  %v561_v47 = vand.u32 2147483647, %v555_v44  ;;  %v559_v5 = vmax.f32 %v555_v44, 0.0 }
 0x201   :  { %v564_v48 = vmul.f32 1.442695, %v562_v46  ;;  %v563_v37 = vsub.f32 0.0, %v561_v47 }
 0x203   :  { %966 = vpow2.f32 %v564_v48  ;;  %v566_v49 = vmul.f32 1.442695, %v563_v37 }
 0x205   :  { %968 = vpow2.f32 %v566_v49 }
 0x20d   :  { %v967_v50 = vpop.eup %966 }
 0x20e   :  { %v568_v51 = vadd.f32 1.0, %v967_v50  ;;  %v571_v54 = vmul.f32 -0.5, %v967_v50  ;;  %v574_v57 = vand.u32 2147483647, %v967_v50 }
 0x20f   :  { %v969_v52 = vpop.eup %968 }
 0x210   :  { %970 = vlog2.f32 %v568_v51  ;;  %v577_v53 = vadd.f32 1.0, %v969_v52  ;;  %v580_v55 = vmul.f32 -0.5, %v969_v52  ;;  %v572_v56 = vadd.f32 1.0, %v571_v54 }
 0x211   :  { %v583_v60 = vand.u32 2147483647, %v969_v52  ;;  %vm575_vm3 = vcmp.lt.f32.partialorder %v574_v57, 0.0004427343 }
 0x212   :  { %972 = vlog2.f32 %v577_v53  ;;  %v581_v58 = vadd.f32 1.0, %v580_v55  ;;  %v573_v62 = vmul.f32 %v967_v50, %v572_v56 }
 0x213   :  { %vm584_vm4 = vcmp.lt.f32.partialorder %v583_v60, 0.0004427343 }
 0x214   :  { %v582_v3 = vmul.f32 %v969_v52, %v581_v58 }
 0x21a   :  { %v971_v59 = vpop.eup %970 }
 0x21b   :  { %v570_v61 = vmul.f32 0.6931472, %v971_v59 }
 0x21c   :  { %v973_v63 = vpop.eup %972 }
 0x21d   :  { %v576_v1 = vsel %vm575_vm3, %v573_v62, %v570_v61  ;;  %v579_v2 = vmul.f32 0.6931472, %v973_v63 }
 0x21e   :  { %v586_v4 = vadd.f32 %v576_v1, %v558_v0 }
 0x21f   :  { %v585_v6 = vsel %vm584_vm4, %v582_v3, %v579_v2 }
 0x220   :  { %v587_v7 = vadd.f32 %v585_v6, %v559_v5  ;;  %v789_v8 = vadd.f32 -0.6931472, %v586_v4 }
 0x222   :  { %v790_v9 = vadd.f32 -0.6931472, %v587_v7 }
 0x224   :  { %v590_v10 = vpack.c.bf16 %v790_v9, %v789_v8 }
 0x226   :  { %901 = vmatmul.mubr.bf16.vlgmr.msra.gmra.mrb[4].mxu1 %v590_v10 }
 0x2f9   :  { %v696_v12 = vpop.f32.mrb[4].mxu1 }
 0x2fa   :  { %v697_v13 = vadd.f32 %v791_v11, %v696_v12  ;;  %v902_v14 = vpop.f32.mrb[5].mxu1 }
 0x2fb   :  { %v699_v15 = vpop.f32.mrb[6].mxu1 }
 0x2fc   :  { %v705_v16 = vand.u32 2147483647, %v697_v13  ;;  %v700_v17 = vadd.f32 %v791_v11, %v699_v15  ;;  %v903_v18 = vpop.f32.mrb[7].mxu1  ;;  %v703_v39 = vmax.f32 %v697_v13, 0.0 }
 0x2fe   :  { %v707_v19 = vsub.f32 0.0, %v705_v16  ;;  %v706_v20 = vand.u32 2147483647, %v700_v17  ;;  %v704_v44 = vmax.f32 %v700_v17, 0.0 }
 0x300   :  { %v709_v21 = vmul.f32 1.442695, %v707_v19  ;;  %v708_v22 = vsub.f32 0.0, %v706_v20 }
 0x302   :  { %974 = vpow2.f32 %v709_v21  ;;  %v711_v23 = vmul.f32 1.442695, %v708_v22 }
 0x304   :  { %976 = vpow2.f32 %v711_v23 }
 0x30c   :  { %v975_v24 = vpop.eup %974 }
 0x30d   :  { %v713_v25 = vadd.f32 1.0, %v975_v24  ;;  %v716_v28 = vmul.f32 -0.5, %v975_v24  ;;  %v719_v31 = vand.u32 2147483647, %v975_v24 }
 0x30e   :  { %v977_v26 = vpop.eup %976 }
 0x30f   :  { %978 = vlog2.f32 %v713_v25  ;;  %v722_v27 = vadd.f32 1.0, %v977_v26  ;;  %v725_v29 = vmul.f32 -0.5, %v977_v26  ;;  %v717_v30 = vadd.f32 1.0, %v716_v28 }
 0x310   :  { %v728_v34 = vand.u32 2147483647, %v977_v26  ;;  %vm720_vm5 = vcmp.lt.f32.partialorder %v719_v31, 0.0004427343 }
 0x311   :  { %980 = vlog2.f32 %v722_v27  ;;  %v726_v32 = vadd.f32 1.0, %v725_v29  ;;  %v718_v36 = vmul.f32 %v975_v24, %v717_v30 }
 0x312   :  { %vm729_vm6 = vcmp.lt.f32.partialorder %v728_v34, 0.0004427343 }
 0x313   :  { %v727_v42 = vmul.f32 %v977_v26, %v726_v32 }
 0x319   :  { %v979_v33 = vpop.eup %978 }
 0x31a   :  { %v715_v35 = vmul.f32 0.6931472, %v979_v33 }
 0x31b   :  { %v981_v38 = vpop.eup %980 }
 0x31c   :  { %v721_v40 = vsel %vm720_vm5, %v718_v36, %v715_v35  ;;  %v724_v41 = vmul.f32 0.6931472, %v981_v38 }
 0x31d   :  { %v731_v43 = vadd.f32 %v721_v40, %v703_v39 }
 0x31e   :  { %v730_v45 = vsel %vm729_vm6, %v727_v42, %v724_v41 }
 0x31f   :  { %v800_v46 = vadd.f32 -0.6931472, %v731_v43  ;;  %v732_v47 = vadd.f32 %v730_v45, %v704_v44 }
 0x321   :  { %735 = vst [vmem:[%s1238_s10] sm:$0xff] %v800_v46  ;;  %v801_v48 = vadd.f32 -0.6931472, %v732_v47 }
 0x323   :  { %736 = vst [vmem:[%s1238_s10 + $0x8] sm:$0xff] %v801_v48 }

// kernel: megnet_layer_forward.8
= control target key start
LH: loop header
LB: loop body
LE: loop exit
PB: predicated region body
PF: predicated region fallthrough
CT: control target
= control target key end

     0   :  { %v247_v0 = vmov 0.0   ;;  %vm248_vm0 = vmmov 0   ;;  %v249_v2 = vmov 0   ;;  %v25_v9 = vlaneseq  ;;  %s307_s2 = inlined_call_operand.vmem [shape: bf16[128,128], index: 2, kind: input, shape index: {}]   ;;  %s308_s1 = inlined_call_operand.vmem [shape: f32[16,1], index: 1, kind: input, shape index: {}]   ;;  %s309_s0 = inlined_call_operand.vmem [shape: s32[1,128], index: 0, kind: input, shape index: {}]   ;;  %s310_s3 = inlined_call_operand.vmem [shape: bf16[16,128], index: 3, kind: output, shape index: {}]  }
   0x1   :  { %214 = vmatprep.subr.bf16.mxu0 %v247_v0  ;;  %v239_v1 = vld [vmem:[%s307_s2] sm:$0xff]   ;;  %230 = vmatprep.mubr.msk.bf16.mxu0 %vm248_vm0, %v247_v0  ;;  %v240_v3 = vld [vmem:[%s307_s2 + $0x8] sm:$0xff]   ;;  %v241_v4 = vld [vmem:[%s307_s2 + $0x10] sm:$0xff]   ;;  %v250_v16 = vmov 1.0|1.0  }
   0x2   :  { %238 = vset.pattern.permute.xlu0 %v249_v2  ;;  %215 = vmatpush3.bf16.msra.mxu0 %v239_v1  ;;  %v155_v5 = vld [vmem:[%s308_s1] sm:$0xff]  ;;  %v242_v6 = vld [vmem:[%s307_s2 + $0x18] sm:$0xff]   ;;  %v156_v7 = vld [vmem:[%s308_s1 + $0x8] sm:$0xff]  ;;  %v26_v11 = vshrl.u32 %v25_v9, 7 }
   0x3   :  { %216 = vmatprep.subr.bf16.mxu0 %v247_v0  ;;  %159 = vperm.xlu0 %238, %v155_v5   ;;  %v243_v8 = vld [vmem:[%s307_s2 + $0x20] sm:$0xff]   ;;  %v244_v10 = vld [vmem:[%s307_s2 + $0x28] sm:$0xff]   ;;  %v245_v12 = vld [vmem:[%s307_s2 + $0x30] sm:$0xff]  }
   0x4   :  { %v27_v13 = vadd.s32 8, %v26_v11  ;;  %v183_v14 = vld [vmem:[%s309_s0] ss:$0 sm:$0xff]  ;;  %v246_v15 = vld [vmem:[%s307_s2 + $0x38] sm:$0xff]  }
   0x5   :  { %vm32_vm1 = vcmp.eq.s32.totalorder %v26_v11, %v183_v14 }
   0x6   :  { %217 = vmatpush3.bf16.msra.mxu0 %v240_v3  ;;  %vm33_vm2 = vcmp.eq.s32.totalorder %v27_v13, %v183_v14 }
   0x7   :  { %218 = vmatprep.subr.bf16.mxu0 %v247_v0  ;;  %164 = vperm.xlu0 %238, %v156_v7   ;;  %vm194_vm3 = vmpackc.low %vm33_vm2, %vm32_vm1 }
   0xa   :  { %219 = vmatpush3.bf16.msra.mxu0 %v241_v4 }
   0xb   :  { %220 = vmatprep.subr.bf16.mxu0 %v247_v0 }
   0xe   :  { %221 = vmatpush3.bf16.msra.mxu0 %v242_v6 }
   0xf   :  { %222 = vmatprep.subr.bf16.mxu0 %v247_v0 }
  0x12   :  { %223 = vmatpush3.bf16.msra.mxu0 %v243_v8 }
  0x13   :  { %224 = vmatprep.subr.bf16.mxu0 %v247_v0 }
  0x16   :  { %225 = vmatpush3.bf16.msra.mxu0 %v244_v10 }
  0x17   :  { %226 = vmatprep.subr.bf16.mxu0 %v247_v0 }
  0x1a   :  { %227 = vmatpush3.bf16.msra.mxu0 %v245_v12 }
  0x1b   :  { %228 = vmatprep.subr.bf16.mxu0 %v247_v0 }
  0x1e   :  { %229 = vmatpush3.bf16.msra.mxu0 %v246_v15 }
  0x21   :  { %231 = vmatmul.mubr.msk.bf16.vlgmr.msra.gmra.mrb[0].mxu0 %vm194_vm3, %v250_v16 }
  0x82   :  { %v160_v17 = vpop.permute.xlu0 %159 }
  0x86   :  { %v165_v20 = vpop.permute.xlu0 %164 }
  0xf4   :  { %v139_v18 = vpop.f32.mrb[0].mxu0 }
  0xf5   :  { %v232_v19 = vpop.f32.mrb[1].mxu0  ;;  %v167_v22 = vmul.f32 %v160_v17, %v139_v18 }
  0xf6   :  { %v142_v21 = vpop.f32.mrb[2].mxu0 }
  0xf7   :  { %v168_v23 = vmul.f32 %v165_v20, %v142_v21  ;;  %v233_v24 = vpop.f32.mrb[3].mxu0 }
  0xf9   :  { %v203_v25 = vpack.c.bf16 %v168_v23, %v167_v22 }
  0xfb   :  { %204 = vst [vmem:[%s310_s3] sm:$0xff] %v203_v25  }

// kernel: megnet_layer_forward.9
= control target key start
LH: loop header
LB: loop body
LE: loop exit
PB: predicated region body
PF: predicated region fallthrough
CT: control target
= control target key end

     0   :  { %v896_v1 = vmov 0.0   ;;  %vm897_vm0 = vmmov 0   ;;  %s1122_s3 = inlined_call_operand.vmem [shape: bf16[384,128], index: 3, kind: input, shape index: {}]   ;;  %s1123_s1 = inlined_call_operand.vmem [shape: bf16[16,128], index: 1, kind: input, shape index: {}]   ;;  %s1124_s0 = inlined_call_operand.vmem [shape: bf16[16,128], index: 0, kind: input, shape index: {}]   ;;  %s1125_s2 = inlined_call_operand.vmem [shape: bf16[16,128], index: 2, kind: input, shape index: {}]   ;;  %s1126_s5 = inlined_call_operand.vmem [shape: bf16[128,128], index: 5, kind: input, shape index: {}]   ;;  %s1127_s4 = inlined_call_operand.vmem [shape: f32[1,128], index: 4, kind: input, shape index: {}]   ;;  %s1128_s7 = inlined_call_operand.vmem [shape: bf16[128,128], index: 7, kind: input, shape index: {}]   ;;  %s1129_s6 = inlined_call_operand.vmem [shape: f32[1,128], index: 6, kind: input, shape index: {}]   ;;  %s1130_s8 = inlined_call_operand.vmem [shape: f32[1,128], index: 8, kind: input, shape index: {}]   ;;  %s1131_s9 = inlined_call_operand.vmem [shape: f32[16,128], index: 9, kind: output, shape index: {}]  }
   0x1   :  { %v829_v0 = vld [vmem:[%s1122_s3 + $0x40] sm:$0xff]   ;;  %767 = vmatprep.subr.bf16.mxu1 %v896_v1  ;;  %783 = vmatprep.mubr.msk.bf16.mxu1 %vm897_vm0, %v896_v1  ;;  %v832_v4 = vld [vmem:[%s1122_s3 + $0x48] sm:$0xff]   ;;  %v835_v7 = vld [vmem:[%s1122_s3 + $0x50] sm:$0xff]  }
   0x2   :  { %v830_v2 = vld [vmem:[%s1122_s3] sm:$0xff]   ;;  %718 = vmatprep.subr.bf16.mxu0 %v829_v0  ;;  %v833_v5 = vld [vmem:[%s1122_s3 + $0x8] sm:$0xff]   ;;  %v836_v8 = vld [vmem:[%s1122_s3 + $0x10] sm:$0xff]  }
   0x3   :  { %v831_v3 = vld [vmem:[%s1122_s3 + $0x80] sm:$0xff]   ;;  %719 = vmatpush3.bf16.msra.mxu0 %v830_v2  ;;  %v834_v6 = vld [vmem:[%s1122_s3 + $0x88] sm:$0xff]   ;;  %v837_v9 = vld [vmem:[%s1122_s3 + $0x90] sm:$0xff]  }
   0x4   :  { %768 = vmatpush3.bf16.msra.mxu1 %v831_v3  ;;  %720 = vmatprep.subr.bf16.mxu0 %v832_v4  ;;  %v838_v10 = vld [vmem:[%s1122_s3 + $0x58] sm:$0xff]   ;;  %v841_v13 = vld [vmem:[%s1122_s3 + $0x60] sm:$0xff]   ;;  %v844_v16 = vld [vmem:[%s1122_s3 + $0x68] sm:$0xff]  }
   0x5   :  { %769 = vmatprep.subr.bf16.mxu1 %v896_v1  ;;  %v839_v11 = vld [vmem:[%s1122_s3 + $0x18] sm:$0xff]   ;;  %v842_v14 = vld [vmem:[%s1122_s3 + $0x20] sm:$0xff]   ;;  %v845_v17 = vld [vmem:[%s1122_s3 + $0x28] sm:$0xff]  }
   0x6   :  { %v840_v12 = vld [vmem:[%s1122_s3 + $0x98] sm:$0xff]   ;;  %v843_v15 = vld [vmem:[%s1122_s3 + $0xa0] sm:$0xff]   ;;  %v846_v18 = vld [vmem:[%s1122_s3 + $0xa8] sm:$0xff]  }
   0x7   :  { %721 = vmatpush3.bf16.msra.mxu0 %v833_v5  ;;  %v847_v19 = vld [vmem:[%s1122_s3 + $0x70] sm:$0xff]   ;;  %v852_v22 = vld [vmem:[%s1123_s1] sm:$0xff]   ;;  %v850_v23 = vld [vmem:[%s1122_s3 + $0x78] sm:$0xff]  }
   0x8   :  { %770 = vmatpush3.bf16.msra.mxu1 %v834_v6  ;;  %722 = vmatprep.subr.bf16.mxu0 %v835_v7  ;;  %v848_v20 = vld [vmem:[%s1122_s3 + $0x30] sm:$0xff]   ;;  %v851_v24 = vld [vmem:[%s1122_s3 + $0x38] sm:$0xff]   ;;  %v854_v26 = vld [vmem:[%s1124_s0] sm:$0xff]  }
   0x9   :  { %771 = vmatprep.subr.bf16.mxu1 %v896_v1  ;;  %v849_v21 = vld [vmem:[%s1122_s3 + $0xb0] sm:$0xff]   ;;  %288 = vmatprep.mubr.bf16.mxu0 %v852_v22  ;;  %v853_v25 = vld [vmem:[%s1122_s3 + $0xb8] sm:$0xff]   ;;  %v855_v27 = vld [vmem:[%s1125_s2] sm:$0xff]  }
   0xa   :  { %v856_v28 = vld [vmem:[%s1126_s5] sm:$0xff]   ;;  %v857_v29 = vld [vmem:[%s1126_s5 + $0x8] sm:$0xff]   ;;  %v858_v30 = vld [vmem:[%s1126_s5 + $0x10] sm:$0xff]  }
   0xb   :  { %723 = vmatpush3.bf16.msra.mxu0 %v836_v8  ;;  %v859_v31 = vld [vmem:[%s1126_s5 + $0x18] sm:$0xff]   ;;  %v860_v32 = vld [vmem:[%s1126_s5 + $0x20] sm:$0xff]   ;;  %v861_v33 = vld [vmem:[%s1126_s5 + $0x28] sm:$0xff]  }
   0xc   :  { %772 = vmatpush3.bf16.msra.mxu1 %v837_v9  ;;  %724 = vmatprep.subr.bf16.mxu0 %v838_v10  ;;  %v862_v34 = vld [vmem:[%s1126_s5 + $0x30] sm:$0xff]   ;;  %v863_v35 = vld [vmem:[%s1126_s5 + $0x38] sm:$0xff]   ;;  %v669_v38 = vld [vmem:[%s1127_s4] ss:$0 sm:$0xff] }
   0xd   :  { %773 = vmatprep.subr.bf16.mxu1 %v896_v1  ;;  %v867_v22 = vld [vmem:[%s1128_s7 + $0x18] sm:$0xff]  }
   0xf   :  { %725 = vmatpush3.bf16.msra.mxu0 %v839_v11 }
  0x10   :  { %774 = vmatpush3.bf16.msra.mxu1 %v840_v12  ;;  %726 = vmatprep.subr.bf16.mxu0 %v841_v13 }
  0x11   :  { %775 = vmatprep.subr.bf16.mxu1 %v896_v1 }
  0x13   :  { %727 = vmatpush3.bf16.msra.mxu0 %v842_v14 }
  0x14   :  { %776 = vmatpush3.bf16.msra.mxu1 %v843_v15  ;;  %728 = vmatprep.subr.bf16.mxu0 %v844_v16 }
  0x15   :  { %777 = vmatprep.subr.bf16.mxu1 %v896_v1 }
  0x17   :  { %729 = vmatpush3.bf16.msra.mxu0 %v845_v17 }
  0x18   :  { %778 = vmatpush3.bf16.msra.mxu1 %v846_v18  ;;  %730 = vmatprep.subr.bf16.mxu0 %v847_v19  ;;  %v864_v19 = vld [vmem:[%s1128_s7] sm:$0xff]  }
  0x19   :  { %779 = vmatprep.subr.bf16.mxu1 %v896_v1 }
  0x1b   :  { %731 = vmatpush3.bf16.msra.mxu0 %v848_v20  ;;  %v865_v20 = vld [vmem:[%s1128_s7 + $0x8] sm:$0xff]  }
  0x1c   :  { %780 = vmatpush3.bf16.msra.mxu1 %v849_v21  ;;  %732 = vmatprep.subr.bf16.mxu0 %v850_v23  ;;  %v866_v21 = vld [vmem:[%s1128_s7 + $0x10] sm:$0xff]   ;;  %v868_v23 = vld [vmem:[%s1128_s7 + $0x20] sm:$0xff]  }
  0x1d   :  { %781 = vmatprep.subr.bf16.mxu1 %v896_v1 }
  0x1f   :  { %733 = vmatpush3.bf16.msra.mxu0 %v851_v24  ;;  %v869_v24 = vld [vmem:[%s1128_s7 + $0x28] sm:$0xff]  }
  0x20   :  { %782 = vmatpush3.bf16.msra.mxu1 %v853_v25  ;;  %787 = vmatprep.subr.bf16.mxu0 %v896_v1  ;;  %v870_v25 = vld [vmem:[%s1128_s7 + $0x30] sm:$0xff]  }
  0x21   :  { %807 = vmatprep.subr.bf16.mxu1 %v896_v1 }
  0x22   :  { %289 = vmatmul.mubr.bf16.vlgmr.msra.gmra.mrb[0].mxu0 %v854_v26  ;;  %v871_v26 = vld [vmem:[%s1128_s7 + $0x38] sm:$0xff]  }
  0x23   :  { %784 = vmatmul.mubr.bf16.vlgmr.msra.gmra.mrb[0].mxu1 %v855_v27  ;;  %803 = vmatprep.mubr.msk.bf16.mxu0 %vm897_vm0, %v896_v1  ;;  %v696_v27 = vld [vmem:[%s1129_s6] ss:$0 sm:$0xff] }
  0x24   :  { %823 = vmatprep.mubr.msk.bf16.mxu1 %vm897_vm0, %v896_v1  ;;  %788 = vmatpush3.bf16.msra.mxu0 %v856_v28 }
  0x25   :  { %789 = vmatprep.subr.bf16.mxu0 %v896_v1  ;;  %808 = vmatpush3.bf16.msra.mxu1 %v864_v19 }
  0x26   :  { %809 = vmatprep.subr.bf16.mxu1 %v896_v1 }
  0x28   :  { %790 = vmatpush3.bf16.msra.mxu0 %v857_v29 }
  0x29   :  { %791 = vmatprep.subr.bf16.mxu0 %v896_v1  ;;  %810 = vmatpush3.bf16.msra.mxu1 %v865_v20 }
  0x2a   :  { %811 = vmatprep.subr.bf16.mxu1 %v896_v1 }
  0x2c   :  { %792 = vmatpush3.bf16.msra.mxu0 %v858_v30 }
  0x2d   :  { %793 = vmatprep.subr.bf16.mxu0 %v896_v1  ;;  %812 = vmatpush3.bf16.msra.mxu1 %v866_v21 }
  0x2e   :  { %813 = vmatprep.subr.bf16.mxu1 %v896_v1 }
  0x30   :  { %794 = vmatpush3.bf16.msra.mxu0 %v859_v31 }
  0x31   :  { %795 = vmatprep.subr.bf16.mxu0 %v896_v1  ;;  %814 = vmatpush3.bf16.msra.mxu1 %v867_v22 }
  0x32   :  { %815 = vmatprep.subr.bf16.mxu1 %v896_v1 }
  0x34   :  { %796 = vmatpush3.bf16.msra.mxu0 %v860_v32 }
  0x35   :  { %797 = vmatprep.subr.bf16.mxu0 %v896_v1  ;;  %816 = vmatpush3.bf16.msra.mxu1 %v868_v23 }
  0x36   :  { %817 = vmatprep.subr.bf16.mxu1 %v896_v1 }
  0x38   :  { %798 = vmatpush3.bf16.msra.mxu0 %v861_v33 }
  0x39   :  { %799 = vmatprep.subr.bf16.mxu0 %v896_v1  ;;  %818 = vmatpush3.bf16.msra.mxu1 %v869_v24 }
  0x3a   :  { %819 = vmatprep.subr.bf16.mxu1 %v896_v1 }
  0x3c   :  { %800 = vmatpush3.bf16.msra.mxu0 %v862_v34 }
  0x3d   :  { %801 = vmatprep.subr.bf16.mxu0 %v896_v1  ;;  %820 = vmatpush3.bf16.msra.mxu1 %v870_v25 }
  0x3e   :  { %821 = vmatprep.subr.bf16.mxu1 %v896_v1 }
  0x40   :  { %802 = vmatpush3.bf16.msra.mxu0 %v863_v35 }
  0x41   :  { %822 = vmatpush3.bf16.msra.mxu1 %v871_v26 }
  0xf5   :  { %v734_v36 = vpop.f32.mrb[0].mxu0 }
  0xf6   :  { %v735_v37 = vpop.f32.mrb[1].mxu0  ;;  %v331_v39 = vpop.f32.mrb[0].mxu1 }
  0xf7   :  { %v736_v40 = vadd.f32 %v735_v37, %v734_v36  ;;  %v737_v41 = vpop.f32.mrb[2].mxu0  ;;  %v785_v42 = vpop.f32.mrb[1].mxu1 }
  0xf8   :  { %v738_v43 = vpop.f32.mrb[3].mxu0  ;;  %v334_v44 = vpop.f32.mrb[2].mxu1 }
  0xf9   :  { %v291_v45 = vadd.f32 %v736_v40, %v669_v38  ;;  %v739_v46 = vadd.f32 %v738_v43, %v737_v41  ;;  %v786_v47 = vpop.f32.mrb[3].mxu1 }
  0xfb   :  { %v332_v48 = vadd.f32 %v331_v39, %v291_v45  ;;  %v294_v49 = vadd.f32 %v739_v46, %v669_v38 }
  0xfd   :  { %v340_v50 = vand.u32 2147483647, %v332_v48  ;;  %v335_v51 = vadd.f32 %v334_v44, %v294_v49  ;;  %v338_v8 = vmax.f32 %v332_v48, 0.0 }
  0xff   :  { %v342_v52 = vsub.f32 0.0, %v340_v50  ;;  %v341_v53 = vand.u32 2147483647, %v335_v51  ;;  %v339_v13 = vmax.f32 %v335_v51, 0.0 }
 0x101   :  { %v344_v54 = vmul.f32 1.442695, %v342_v52  ;;  %v343_v55 = vsub.f32 0.0, %v341_v53 }
 0x103   :  { %872 = vpow2.f32 %v344_v54  ;;  %v346_v56 = vmul.f32 1.442695, %v343_v55 }
 0x105   :  { %874 = vpow2.f32 %v346_v56 }
 0x10d   :  { %v873_v57 = vpop.eup %872 }
 0x10e   :  { %v348_v58 = vadd.f32 1.0, %v873_v57  ;;  %v351_v61 = vmul.f32 -0.5, %v873_v57  ;;  %v354_v0 = vand.u32 2147483647, %v873_v57 }
 0x10f   :  { %v875_v59 = vpop.eup %874 }
 0x110   :  { %876 = vlog2.f32 %v348_v58  ;;  %v357_v60 = vadd.f32 1.0, %v875_v59  ;;  %v360_v62 = vmul.f32 -0.5, %v875_v59  ;;  %v352_v63 = vadd.f32 1.0, %v351_v61 }
 0x111   :  { %v363_v4 = vand.u32 2147483647, %v875_v59  ;;  %vm355_vm1 = vcmp.lt.f32.partialorder %v354_v0, 0.0004427343  ;;  %v707_v0 = vld [vmem:[%s1130_s8] ss:$0 sm:$0xff] }
 0x112   :  { %878 = vlog2.f32 %v357_v60  ;;  %v361_v2 = vadd.f32 1.0, %v360_v62  ;;  %v353_v6 = vmul.f32 %v873_v57, %v352_v63 }
 0x113   :  { %vm364_vm2 = vcmp.lt.f32.partialorder %v363_v4, 0.0004427343 }
 0x114   :  { %v362_v11 = vmul.f32 %v875_v59, %v361_v2 }
 0x11a   :  { %v877_v3 = vpop.eup %876 }
 0x11b   :  { %v350_v5 = vmul.f32 0.6931472, %v877_v3 }
 0x11c   :  { %v879_v7 = vpop.eup %878 }
 0x11d   :  { %v356_v9 = vsel %vm355_vm1, %v353_v6, %v350_v5  ;;  %v359_v10 = vmul.f32 0.6931472, %v879_v7 }
 0x11e   :  { %v366_v12 = vadd.f32 %v356_v9, %v338_v8 }
 0x11f   :  { %v365_v14 = vsel %vm364_vm2, %v362_v11, %v359_v10 }
 0x120   :  { %v367_v15 = vadd.f32 %v365_v14, %v339_v13  ;;  %v694_v16 = vadd.f32 -0.6931472, %v366_v12 }
 0x122   :  { %v695_v17 = vadd.f32 -0.6931472, %v367_v15 }
 0x124   :  { %v370_v18 = vpack.c.bf16 %v695_v17, %v694_v16 }
 0x126   :  { %804 = vmatmul.mubr.bf16.vlgmr.msra.gmra.mrb[4].mxu0 %v370_v18 }
 0x1f9   :  { %v476_v28 = vpop.f32.mrb[4].mxu0 }
 0x1fa   :  { %v477_v29 = vadd.f32 %v696_v27, %v476_v28  ;;  %v805_v30 = vpop.f32.mrb[5].mxu0 }
 0x1fb   :  { %v479_v31 = vpop.f32.mrb[6].mxu0 }
 0x1fc   :  { %v485_v32 = vand.u32 2147483647, %v477_v29  ;;  %v480_v33 = vadd.f32 %v696_v27, %v479_v31  ;;  %v806_v34 = vpop.f32.mrb[7].mxu0  ;;  %v483_v53 = vmax.f32 %v477_v29, 0.0 }
 0x1fe   :  { %v487_v35 = vsub.f32 0.0, %v485_v32  ;;  %v486_v36 = vand.u32 2147483647, %v480_v33  ;;  %v484_v58 = vmax.f32 %v480_v33, 0.0 }
 0x200   :  { %v489_v37 = vmul.f32 1.442695, %v487_v35  ;;  %v488_v1 = vsub.f32 0.0, %v486_v36 }
 0x202   :  { %880 = vpow2.f32 %v489_v37  ;;  %v491_v38 = vmul.f32 1.442695, %v488_v1 }
 0x204   :  { %882 = vpow2.f32 %v491_v38 }
 0x20c   :  { %v881_v39 = vpop.eup %880 }
 0x20d   :  { %v493_v40 = vadd.f32 1.0, %v881_v39  ;;  %v496_v43 = vmul.f32 -0.5, %v881_v39  ;;  %v499_v46 = vand.u32 2147483647, %v881_v39 }
 0x20e   :  { %v883_v41 = vpop.eup %882 }
 0x20f   :  { %884 = vlog2.f32 %v493_v40  ;;  %v502_v42 = vadd.f32 1.0, %v883_v41  ;;  %v505_v44 = vmul.f32 -0.5, %v883_v41  ;;  %v497_v45 = vadd.f32 1.0, %v496_v43 }
 0x210   :  { %v508_v49 = vand.u32 2147483647, %v883_v41  ;;  %vm500_vm3 = vcmp.lt.f32.partialorder %v499_v46, 0.0004427343 }
 0x211   :  { %886 = vlog2.f32 %v502_v42  ;;  %v506_v47 = vadd.f32 1.0, %v505_v44  ;;  %v498_v51 = vmul.f32 %v881_v39, %v497_v45 }
 0x212   :  { %vm509_vm4 = vcmp.lt.f32.partialorder %v508_v49, 0.0004427343 }
 0x213   :  { %v507_v56 = vmul.f32 %v883_v41, %v506_v47 }
 0x219   :  { %v885_v48 = vpop.eup %884 }
 0x21a   :  { %v495_v50 = vmul.f32 0.6931472, %v885_v48 }
 0x21b   :  { %v887_v52 = vpop.eup %886 }
 0x21c   :  { %v501_v54 = vsel %vm500_vm3, %v498_v51, %v495_v50  ;;  %v504_v55 = vmul.f32 0.6931472, %v887_v52 }
 0x21d   :  { %v511_v57 = vadd.f32 %v501_v54, %v483_v53 }
 0x21e   :  { %v510_v59 = vsel %vm509_vm4, %v507_v56, %v504_v55 }
 0x21f   :  { %v512_v60 = vadd.f32 %v510_v59, %v484_v58  ;;  %v705_v61 = vadd.f32 -0.6931472, %v511_v57 }
 0x221   :  { %v706_v62 = vadd.f32 -0.6931472, %v512_v60 }
 0x223   :  { %v515_v63 = vpack.c.bf16 %v706_v62, %v705_v61 }
 0x225   :  { %824 = vmatmul.mubr.bf16.vlgmr.msra.gmra.mrb[4].mxu1 %v515_v63 }
 0x2f8   :  { %v621_v2 = vpop.f32.mrb[4].mxu1 }
 0x2f9   :  { %v622_v3 = vadd.f32 %v707_v0, %v621_v2  ;;  %v825_v4 = vpop.f32.mrb[5].mxu1 }
 0x2fa   :  { %v624_v5 = vpop.f32.mrb[6].mxu1 }
 0x2fb   :  { %v630_v6 = vand.u32 2147483647, %v622_v3  ;;  %v625_v7 = vadd.f32 %v707_v0, %v624_v5  ;;  %v826_v8 = vpop.f32.mrb[7].mxu1  ;;  %v628_v28 = vmax.f32 %v622_v3, 0.0 }
 0x2fd   :  { %v632_v9 = vsub.f32 0.0, %v630_v6  ;;  %v631_v10 = vand.u32 2147483647, %v625_v7  ;;  %v629_v33 = vmax.f32 %v625_v7, 0.0 }
 0x2ff   :  { %v634_v11 = vmul.f32 1.442695, %v632_v9  ;;  %v633_v12 = vsub.f32 0.0, %v631_v10 }
 0x301   :  { %888 = vpow2.f32 %v634_v11  ;;  %v636_v13 = vmul.f32 1.442695, %v633_v12 }
 0x303   :  { %890 = vpow2.f32 %v636_v13 }
 0x30b   :  { %v889_v14 = vpop.eup %888 }
 0x30c   :  { %v638_v15 = vadd.f32 1.0, %v889_v14  ;;  %v641_v18 = vmul.f32 -0.5, %v889_v14  ;;  %v644_v21 = vand.u32 2147483647, %v889_v14 }
 0x30d   :  { %v891_v16 = vpop.eup %890 }
 0x30e   :  { %892 = vlog2.f32 %v638_v15  ;;  %v647_v17 = vadd.f32 1.0, %v891_v16  ;;  %v650_v19 = vmul.f32 -0.5, %v891_v16  ;;  %v642_v20 = vadd.f32 1.0, %v641_v18 }
 0x30f   :  { %v653_v24 = vand.u32 2147483647, %v891_v16  ;;  %vm645_vm5 = vcmp.lt.f32.partialorder %v644_v21, 0.0004427343 }
 0x310   :  { %894 = vlog2.f32 %v647_v17  ;;  %v651_v22 = vadd.f32 1.0, %v650_v19  ;;  %v643_v26 = vmul.f32 %v889_v14, %v642_v20 }
 0x311   :  { %vm654_vm6 = vcmp.lt.f32.partialorder %v653_v24, 0.0004427343 }
 0x312   :  { %v652_v31 = vmul.f32 %v891_v16, %v651_v22 }
 0x318   :  { %v893_v23 = vpop.eup %892 }
 0x319   :  { %v640_v25 = vmul.f32 0.6931472, %v893_v23 }
 0x31a   :  { %v895_v27 = vpop.eup %894 }
 0x31b   :  { %v646_v29 = vsel %vm645_vm5, %v643_v26, %v640_v25  ;;  %v649_v30 = vmul.f32 0.6931472, %v895_v27 }
 0x31c   :  { %v656_v32 = vadd.f32 %v646_v29, %v628_v28 }
 0x31d   :  { %v655_v34 = vsel %vm654_vm6, %v652_v31, %v649_v30 }
 0x31e   :  { %v716_v35 = vadd.f32 -0.6931472, %v656_v32  ;;  %v657_v36 = vadd.f32 %v655_v34, %v629_v33 }
 0x320   :  { %660 = vst [vmem:[%s1131_s9] sm:$0xff] %v716_v35  ;;  %v717_v37 = vadd.f32 -0.6931472, %v657_v36 }
 0x322   :  { %661 = vst [vmem:[%s1131_s9 + $0x8] sm:$0xff] %v717_v37 }

</bundles_post_ra>
